<compile_context>
chip_gen: v5e
topology: v5e:2x2
jax: 0.10.0
libtpu: 0.0.40
codegen_flags: <defaults>
</compile_context>

<pallas_src>
import math

import jax
import jax.numpy as jnp
import numpy as np
from jax.experimental import pallas as pl
from jax.experimental.pallas import tpu as pltpu

PHI = (1.0 + math.sqrt(5.0)) / 2.0
LN_EPS = 1e-5  # torch nn.LayerNorm default


def _normalize(x):
    """(x - mean) * rsqrt(var + eps) along the last axis, in f32."""
    mu = jnp.mean(x, axis=-1, keepdims=True)
    xc = x - mu
    var = jnp.mean(xc * xc, axis=-1, keepdims=True)
    return xc * jax.lax.rsqrt(var + LN_EPS)


def _layernorm(x, gamma, beta):
    return _normalize(x) * gamma + beta


def _make_kernel(merged):
    """Build the kernel.  `merged=True` (D % 128 == 0) uses a single (R, 2D)
    bf16 scratch and one K=2D projection matmul per vocab tile; otherwise the
    real/imag halves are kept in separate scratches with two K=D matmuls."""

    def qllm_kernel(embed_ref, wg_ref, bg_ref, we_ref, be_ref, cos_ref, sin_ref,
                    ln_g_ref, ln_b_ref, *rest):
        if merged:
            wo_ref, bo_ref, out_ref, a_buf = rest
        else:
            wor_ref, woi_ref, bo_ref, out_ref, ar_buf, ai_buf = rest

        BB, L, D = embed_ref.shape
        R = BB * L

        # LN table rows (constants already folded in the wrapper):
        #   0 state.in  (gamma/beta * 0.01)
        #   1 state.out (raw)
        #   2 q         (gamma/beta * 0.01 / sqrt(D))
        #   3 k         (gamma/beta * 0.01 / sqrt(D))
        #   4 v         (gamma/beta * 0.01 * 0.1)
        #   5 attn.out  (raw)
        g = lambda i: ln_g_ref[i, :]
        b = lambda i: ln_b_ref[i, :]

        @pl.when(pl.program_id(1) == 0)
        def _state_and_attention():
            x = embed_ref[...].reshape(R, D)                      # (R, D) f32

            # ---------------- SimpleQuantumState ----------------
            x = _layernorm(x, g(0), b(0))                         # 0.01 folded into row 0
            xb = x.astype(jnp.bfloat16)                           # MXU operands in bf16
            ground = jnp.dot(xb, wg_ref[...],
                             preferred_element_type=jnp.float32) + bg_ref[0] + x
            excited = jnp.dot(xb, we_ref[...],
                              preferred_element_type=jnp.float32) + be_ref[0] + x
            cr = ground + excited * cos_ref[0]                    # cos/sin(phase) precomputed
            ci = excited * sin_ref[0]
            inv_n = jax.lax.rsqrt(cr * cr + ci * ci + 1e-8)
            state_r = _layernorm(cr * inv_n, g(1), b(1))
            state_i = _layernorm(ci * inv_n, g(1), b(1))

            # -------- BasicQuantumAttention (q = k = v = state) --------
            # q/k/v layernorms see only two distinct inputs -> normalize once per
            # stream; the per-head layernorms become cheap affines / row dots.
            nr = _normalize(state_r).reshape(BB, L, D)            # (BB, L, D) f32
            ni = _normalize(state_i).reshape(BB, L, D)

            # Phase logits only depend on row sums; with 0.01/sqrt(D) folded into
            # rows 2/3 of the LN table, no per-element scaling is left here.
            const = jnp.sum(b(2)) - jnp.sum(b(3)) + 1e-8
            sq_r = jnp.sum(nr * g(2), -1, keepdims=True)          # (BB, L, 1)
            sq_i = jnp.sum(ni * g(2), -1, keepdims=True)
            sk_r = jnp.sum(nr * g(3), -1)                         # (BB, L)
            sk_i = jnp.sum(ni * g(3), -1)

            real_sum = sq_r - sk_r[:, None, :] + const            # (BB, L, L)
            imag_sum = sq_i - sk_i[:, None, :] + const
            # cos(atan2(y, x)) == x * rsqrt(x^2 + y^2)   (exact identity)
            cos_phase = real_sum * jax.lax.rsqrt(real_sum * real_sum + imag_sum * imag_sum)
            logits = cos_phase * 10.0
            m = jnp.max(logits, -1, keepdims=True)
            e = jnp.exp(logits - m)
            # Softmax denominator on the EUP slot (approx reciprocal).
            attn = (e * pl.reciprocal(jnp.sum(e, -1, keepdims=True),
                                      approx=True)).astype(jnp.bfloat16)  # (BB, L, L)

            # v LN 0.01 and attention-output 0.1 folded into row 4.
            vr = (nr * g(4) + b(4)).astype(jnp.bfloat16)          # (BB, L, D)
            vi = (ni * g(4) + b(4)).astype(jnp.bfloat16)
            out_r = jnp.einsum("bqk,bkd->bqd", attn, vr,
                               preferred_element_type=jnp.float32)
            out_i = jnp.einsum("bqk,bkd->bqd", attn, vi,
                               preferred_element_type=jnp.float32)
            ar_ln = _layernorm(out_r.reshape(R, D), g(5), b(5))
            ai_ln = _layernorm(out_i.reshape(R, D), g(5), b(5))

            if merged:
                # Lane-aligned slice stores (D is a multiple of 128 here).
                a_buf[:, :D] = ar_ln.astype(jnp.bfloat16)
                a_buf[:, D:] = ai_ln.astype(jnp.bfloat16)
            else:
                ar_buf[...] = ar_ln.astype(jnp.bfloat16)
                ai_buf[...] = ai_ln.astype(jnp.bfloat16)

        # ---------------- output projection for this vocab tile ----------------
        if merged:
            # concat(real, imag) @ Wo as ONE K=2D MXU matmul.
            proj = jnp.dot(a_buf[...], wo_ref[...], preferred_element_type=jnp.float32)
        else:
            # concat(real, imag) @ Wo == real @ Wo[:D] + imag @ Wo[D:]
            proj = jnp.dot(ar_buf[...], wor_ref[...], preferred_element_type=jnp.float32)
            proj = proj + jnp.dot(ai_buf[...], woi_ref[...], preferred_element_type=jnp.float32)
        proj = proj + bo_ref[...]
        out_ref[...] = proj.reshape(out_ref.shape)

    return qllm_kernel


def _round_up(x, m):
    return ((x + m - 1) // m) * m


def _pick_batch_block(B, L, target_rows=512):
    """Largest divisor of B with ~target_rows MXU rows per grid step, but keep
    at least two batch tiles when B > 1 so both TensorCores get work on v7x."""
    bb = max(1, min(B, max(1, target_rows // max(L, 1))))
    while B % bb:
        bb -= 1
    if B > 1 and B // bb < 2:
        bb = max(d for d in range(1, B // 2 + 1) if B % d == 0)
    return bb


def _vmem_limit_bytes():
    """Scoped-VMEM limit: physical capacity minus ~16 MiB Mosaic headroom,
    capped at 100 MiB (v5e/v6e have 128 MiB, v7x only 64 MiB per core)."""
    try:
        cap = int(pltpu.get_tpu_info().vmem_capacity_bytes)
    except Exception:
        cap = 64 * 1024 * 1024
    return int(max(32 * 1024 * 1024, min(cap - 16 * 1024 * 1024, 100 * 1024 * 1024)))


def quantum_llm_forward(ids, params):
    """ids: (B, L) int32 token ids -> (B, L, V) f32 logits."""
    emb = params["embedding"][ids].astype(jnp.float32)            # (B, L, D)
    B, L, D = emb.shape
    wo = params["wo"]                                              # (2D, V)
    V = wo.shape[1]
    scale = float(D) ** (-0.5)

    # Vocab tiling: lane-dense, 128-padded, tiles up to 2048 lanes.
    TILE_V = min(2048, _round_up(V, 128))
    V_pad = _round_up(V, TILE_V)

    # Hoist parameter-only transcendentals out of the kernel (EUP savings).
    ph = jnp.tanh(params["phase"]) * (PHI * 0.01)                  # (1, D)
    cos_ph = jnp.cos(ph).astype(jnp.float32)
    sin_ph = jnp.sin(ph).astype(jnp.float32)

    # Fold the fixed scalar factors of the forward pass into the LN tables
    # (exact in real arithmetic): row 0 *0.01, rows 2/3 *0.01/sqrt(D),
    # row 4 *0.01*0.1, rows 1/5 unchanged.
    fold = jnp.array([0.01, 1.0, 0.01 * scale, 0.01 * scale, 0.001, 1.0],
                     jnp.float32)[:, None]
    ln_gf = (params["ln_g"] * fold).astype(jnp.float32)
    ln_bf = (params["ln_b"] * fold).astype(jnp.float32)

    # bf16 MXU operands: halves weight DMA bytes + VMEM; biases/LN params stay f32.
    wg = params["wg"].astype(jnp.bfloat16)
    we = params["we"].astype(jnp.bfloat16)
    pad_v = ((0, 0), (0, V_pad - V))
    bo = jnp.pad(params["bo"], pad_v).astype(jnp.float32)          # (1, V_pad)

    BB = _pick_batch_block(B, L)
    R = BB * L
    grid = (B // BB, V_pad // TILE_V)

    merged = (D % 128 == 0)
    if merged:
        wo_args = (jnp.pad(wo, pad_v).astype(jnp.bfloat16),)       # (2D, V_pad)
        wo_specs = [pl.BlockSpec((2 * D, TILE_V), lambda bt, vt: (0, vt))]
        scratch = [pltpu.VMEM((R, 2 * D), jnp.bfloat16)]           # cached attn [real|imag]
    else:
        wo_args = (jnp.pad(wo[:D], pad_v).astype(jnp.bfloat16),    # (D, V_pad)
                   jnp.pad(wo[D:], pad_v).astype(jnp.bfloat16))
        wo_specs = [pl.BlockSpec((D, TILE_V), lambda bt, vt: (0, vt))] * 2
        scratch = [pltpu.VMEM((R, D), jnp.bfloat16)] * 2

    const = lambda shape: pl.BlockSpec(shape, lambda bt, vt: (0, 0))
    in_specs = [
        pl.BlockSpec((BB, L, D), lambda bt, vt: (bt, 0, 0)),       # embeddings
        const((D, D)),                                             # Wg^T (bf16)
        const((1, D)),                                             # bg
        const((D, D)),                                             # We^T (bf16)
        const((1, D)),                                             # be
        const((1, D)),                                             # cos(phase)
        const((1, D)),                                             # sin(phase)
        const((6, D)),                                             # folded LN gammas
        const((6, D)),                                             # folded LN betas
        *wo_specs,                                                 # Wo tiles (bf16)
        pl.BlockSpec((1, TILE_V), lambda bt, vt: (0, vt)),         # bo
    ]

    # TODO(synk): emit bf16 logits (cast at the out_ref store) when the consumer
    #             tolerates it — the f32 (B, L, V_pad) writeback is the largest
    #             HBM stream at realistic V.
    out = pl.pallas_call(
        _make_kernel(merged),
        out_shape=jax.ShapeDtypeStruct((B, L, V_pad), jnp.float32),
        grid_spec=pltpu.PrefetchScalarGridSpec(
            num_scalar_prefetch=0,
            grid=grid,
            in_specs=in_specs,
            out_specs=pl.BlockSpec((BB, L, TILE_V), lambda bt, vt: (bt, 0, vt)),
            scratch_shapes=scratch,
        ),
        compiler_params=pltpu.CompilerParams(
            # batch tiles are independent (megacore-parallel on v7x); vocab tiles
            # reuse the cached attention scratch, so that axis stays sequential.
            dimension_semantics=("parallel", "arbitrary"),
            vmem_limit_bytes=_vmem_limit_bytes(),
        ),
    )(emb, wg, params["bg"], we, params["be"], cos_ph, sin_ph,
      ln_gf, ln_bf, *wo_args, bo)

    return out if V_pad == V else out[..., :V]


def init_params(key, vocab_size, dim):
    kg, ke, kp, ko = jax.random.split(key, 4)
    # Tokenizer phase table (real/cos component of the normalized complex phases).
    i = jnp.arange(vocab_size, dtype=jnp.float32)[:, None]
    j = jnp.arange(dim, dtype=jnp.float32)[None, :]
    angles = jnp.mod(PHI * math.pi * j + i * math.pi / vocab_size, 2.0 * math.pi) - math.pi
    embedding = jnp.cos(angles) / jnp.sqrt(float(dim))

    xavier_std = 0.01 * math.sqrt(2.0 / (dim + dim))   # xavier_normal_(gain=0.01)
    return dict(
        embedding=embedding,
        wg=jax.random.normal(kg, (dim, dim), jnp.float32) * xavier_std,   # stored (in, out)
        bg=jnp.zeros((1, dim), jnp.float32),
        we=jax.random.normal(ke, (dim, dim), jnp.float32) * xavier_std,
        be=jnp.zeros((1, dim), jnp.float32),
        phase=jax.random.normal(kp, (1, dim), jnp.float32) * 0.001,
        ln_g=jnp.ones((6, dim), jnp.float32),
        ln_b=jnp.zeros((6, dim), jnp.float32),
        wo=jax.random.normal(ko, (2 * dim, vocab_size), jnp.float32) * 0.02,
        bo=jnp.zeros((1, vocab_size), jnp.float32),
    )


def reference_forward(ids, p):
    """Pure-JAX (f32) reference mirroring the torch forward (no constant folds)."""
    x = p["embedding"][ids]
    D = x.shape[-1]
    scale = float(D) ** (-0.5)
    ln = lambda v, i: _layernorm(v, p["ln_g"][i], p["ln_b"][i])
    x = ln(x, 0) * 0.01
    ground = x @ p["wg"] + p["bg"][0] + x
    excited = x @ p["we"] + p["be"][0] + x
    phase = jnp.tanh(p["phase"][0]) * (PHI * 0.01)
    cr = ground + excited * jnp.cos(phase)
    ci = excited * jnp.sin(phase)
    nrm = jnp.sqrt(cr * cr + ci * ci + 1e-8)
    sr, si = ln(cr / nrm, 1), ln(ci / nrm, 1)
    qr, qi = ln(sr, 2) * 0.01, ln(si, 2) * 0.01
    kr, ki = ln(sr, 3) * 0.01, ln(si, 3) * 0.01
    vr, vi = ln(sr, 4) * 0.01, ln(si, 4) * 0.01
    rs = (jnp.sum(qr, -1)[..., :, None] - jnp.sum(kr, -1)[..., None, :]) * scale + 1e-8
    im = (jnp.sum(qi, -1)[..., :, None] - jnp.sum(ki, -1)[..., None, :]) * scale + 1e-8
    attn = jax.nn.softmax(jnp.cos(jnp.arctan2(im, rs)) * 10.0, axis=-1)
    ar = ln(jnp.einsum("blk,bkd->bld", attn, vr) * 0.1, 5)
    ai = ln(jnp.einsum("blk,bkd->bld", attn, vi) * 0.1, 5)
    return jnp.concatenate([ar, ai], -1) @ p["wo"] + p["bo"][0]


if __name__ == "__main__":
    B, L, D, V = 2, 8, 32, 64
    key = jax.random.PRNGKey(0)
    k_ids, k_par, k_g, k_b, k_ph = jax.random.split(key, 5)
    params = init_params(k_par, V, D)

    # With torch-default LayerNorm params (gamma=1, beta=0) the attention row
    # sums are analytically zero, so the phase logits are pure FP-rounding noise
    # and any two correct implementations legitimately diverge.  Perturb the
    # affine params / phase so the kernel-vs-reference comparison is
    # well-conditioned; the forward math is unchanged.
    params["ln_g"] = params["ln_g"] + 0.1 * jax.random.normal(k_g, params["ln_g"].shape, jnp.float32)
    params["ln_b"] = params["ln_b"] + 0.1 * jax.random.normal(k_b, params["ln_b"].shape, jnp.float32)
    params["phase"] = 0.5 * jax.random.normal(k_ph, params["phase"].shape, jnp.float32)

    ids = jax.random.randint(k_ids, (B, L), 0, V, dtype=jnp.int32)

    logits = jax.block_until_ready(quantum_llm_forward(ids, params))
    ref = reference_forward(ids, params)

    np.testing.assert_allclose(np.asarray(logits), np.asarray(ref), rtol=2e-2, atol=1e-2)
    assert logits.shape == (B, L, V)
    print("KERNEL_OK")
</pallas_src>

<mosaic_0001>
module attributes {stable_mosaic.version = 11 : i64} {
  func.func @qllm_kernel(%arg0: i32, %arg1: i32, %arg2: memref<1x8x32xf32, #tpu.memory_space<vmem>>, %arg3: memref<32x32xbf16, #tpu.memory_space<vmem>>, %arg4: memref<1x32xf32, #tpu.memory_space<vmem>>, %arg5: memref<32x32xbf16, #tpu.memory_space<vmem>>, %arg6: memref<1x32xf32, #tpu.memory_space<vmem>>, %arg7: memref<1x32xf32, #tpu.memory_space<vmem>>, %arg8: memref<1x32xf32, #tpu.memory_space<vmem>>, %arg9: memref<6x32xf32, #tpu.memory_space<vmem>>, %arg10: memref<6x32xf32, #tpu.memory_space<vmem>>, %arg11: memref<32x128xbf16, #tpu.memory_space<vmem>>, %arg12: memref<32x128xbf16, #tpu.memory_space<vmem>>, %arg13: memref<1x128xf32, #tpu.memory_space<vmem>>, %arg14: memref<1x8x128xf32, #tpu.memory_space<vmem>>, %arg15: memref<8x32xbf16, #tpu.memory_space<vmem>>, %arg16: memref<8x32xbf16, #tpu.memory_space<vmem>>) attributes {dimension_semantics = [#tpu.dimension_semantics<parallel>, #tpu.dimension_semantics<arbitrary>], iteration_bounds = array<i64: 2, 1>, scalar_prefetch = 0 : i64, scratch_operands = 2 : i64, tpu.core_type = #tpu.core_type<tc>, window_params = [{transform_indices = @transform_0, window_bounds = array<i64: 1, 8, 32>}, {pipeline_mode = #tpu.pipeline_mode<synchronous>, transform_indices = @transform_1, window_bounds = array<i64: 32, 32>}, {pipeline_mode = #tpu.pipeline_mode<synchronous>, transform_indices = @transform_2, window_bounds = array<i64: 1, 32>}, {pipeline_mode = #tpu.pipeline_mode<synchronous>, transform_indices = @transform_3, window_bounds = array<i64: 32, 32>}, {pipeline_mode = #tpu.pipeline_mode<synchronous>, transform_indices = @transform_4, window_bounds = array<i64: 1, 32>}, {pipeline_mode = #tpu.pipeline_mode<synchronous>, transform_indices = @transform_5, window_bounds = array<i64: 1, 32>}, {pipeline_mode = #tpu.pipeline_mode<synchronous>, transform_indices = @transform_6, window_bounds = array<i64: 1, 32>}, {pipeline_mode = #tpu.pipeline_mode<synchronous>, transform_indices = @transform_7, window_bounds = array<i64: 6, 32>}, {pipeline_mode = #tpu.pipeline_mode<synchronous>, transform_indices = @transform_8, window_bounds = array<i64: 6, 32>}, {transform_indices = @transform_9, window_bounds = array<i64: 32, 128>}, {transform_indices = @transform_10, window_bounds = array<i64: 32, 128>}, {transform_indices = @transform_11, window_bounds = array<i64: 1, 128>}, {transform_indices = @transform_12, window_bounds = array<i64: 1, 8, 128>}]} {
    %c0_i32 = arith.constant 0 : i32
    %0 = arith.cmpi eq, %arg1, %c0_i32 : i32
    %1 = arith.extui %0 : i1 to i32
    %c0_i32_0 = arith.constant 0 : i32
    %2 = arith.cmpi ne, %1, %c0_i32_0 : i32
    scf.if %2 {
      %c0_14 = arith.constant 0 : index
      %c0_15 = arith.constant 0 : index
      %c0_16 = arith.constant 0 : index
      %15 = vector.load %arg2[%c0_14, %c0_15, %c0_16] : memref<1x8x32xf32, #tpu.memory_space<vmem>>, vector<1x8x32xf32>
      %16 = vector.shape_cast %15 : vector<1x8x32xf32> to vector<8x32xf32>
      %c0_17 = arith.constant 0 : index
      %c0_18 = arith.constant 0 : index
      %17 = vector.load %arg9[%c0_17, %c0_18] : memref<6x32xf32, #tpu.memory_space<vmem>>, vector<1x32xf32>
      %18 = vector.shape_cast %17 : vector<1x32xf32> to vector<32xf32>
      %c0_19 = arith.constant 0 : index
      %c0_20 = arith.constant 0 : index
      %19 = vector.load %arg10[%c0_19, %c0_20] : memref<6x32xf32, #tpu.memory_space<vmem>>, vector<1x32xf32>
      %20 = vector.shape_cast %19 : vector<1x32xf32> to vector<32xf32>
      %cst_21 = arith.constant dense<0.000000e+00> : vector<8xf32>
      %21 = vector.multi_reduction <add>, %16, %cst_21 [1] : vector<8x32xf32> to vector<8xf32>
      %22 = vector.shape_cast %21 : vector<8xf32> to vector<8x1xf32>
      %cst_22 = arith.constant 3.200000e+01 : f32
      %23 = vector.broadcast %cst_22 : f32 to vector<8x1xf32>
      %24 = arith.divf %22, %23 : vector<8x1xf32>
      %25 = vector.broadcast %24 : vector<8x1xf32> to vector<8x32xf32>
      %26 = arith.subf %16, %25 : vector<8x32xf32>
      %27 = arith.mulf %26, %26 : vector<8x32xf32>
      %cst_23 = arith.constant dense<0.000000e+00> : vector<8xf32>
      %28 = vector.multi_reduction <add>, %27, %cst_23 [1] : vector<8x32xf32> to vector<8xf32>
      %29 = vector.shape_cast %28 : vector<8xf32> to vector<8x1xf32>
      %cst_24 = arith.constant 3.200000e+01 : f32
      %30 = vector.broadcast %cst_24 : f32 to vector<8x1xf32>
      %31 = arith.divf %29, %30 : vector<8x1xf32>
      %cst_25 = arith.constant 9.99999974E-6 : f32
      %32 = vector.broadcast %cst_25 : f32 to vector<8x1xf32>
      %33 = arith.addf %31, %32 : vector<8x1xf32>
      %34 = math.rsqrt %33 : vector<8x1xf32>
      %35 = vector.broadcast %34 : vector<8x1xf32> to vector<8x32xf32>
      %36 = arith.mulf %26, %35 : vector<8x32xf32>
      %37 = vector.shape_cast %18 : vector<32xf32> to vector<1x32xf32>
      %38 = vector.broadcast %37 : vector<1x32xf32> to vector<8x32xf32>
      %39 = arith.mulf %36, %38 : vector<8x32xf32>
      %40 = vector.shape_cast %20 : vector<32xf32> to vector<1x32xf32>
      %41 = vector.broadcast %40 : vector<1x32xf32> to vector<8x32xf32>
      %42 = arith.addf %39, %41 : vector<8x32xf32>
      %43 = arith.truncf %42 : vector<8x32xf32> to vector<8x32xbf16>
      %c0_26 = arith.constant 0 : index
      %c0_27 = arith.constant 0 : index
      %44 = vector.load %arg3[%c0_26, %c0_27] : memref<32x32xbf16, #tpu.memory_space<vmem>>, vector<32x32xbf16>
      %cst_28 = arith.constant dense<0.000000e+00> : vector<8x32xf32>
      %45 = tpu.matmul %43, %44, %cst_28 {dimension_numbers = #tpu.dot_dimension_numbers<[1], [0], [0], [1], [0, 0, 1, 1], [], []>} : vector<8x32xbf16>, vector<32x32xbf16>, vector<8x32xf32> -> vector<8x32xf32>
      %c0_29 = arith.constant 0 : index
      %c0_30 = arith.constant 0 : index
      %46 = vector.load %arg4[%c0_29, %c0_30] : memref<1x32xf32, #tpu.memory_space<vmem>>, vector<1x32xf32>
      %47 = vector.shape_cast %46 : vector<1x32xf32> to vector<32xf32>
      %48 = vector.shape_cast %47 : vector<32xf32> to vector<1x32xf32>
      %49 = vector.broadcast %48 : vector<1x32xf32> to vector<8x32xf32>
      %50 = arith.addf %45, %49 : vector<8x32xf32>
      %51 = arith.addf %50, %42 : vector<8x32xf32>
      %c0_31 = arith.constant 0 : index
      %c0_32 = arith.constant 0 : index
      %52 = vector.load %arg5[%c0_31, %c0_32] : memref<32x32xbf16, #tpu.memory_space<vmem>>, vector<32x32xbf16>
      %cst_33 = arith.constant dense<0.000000e+00> : vector<8x32xf32>
      %53 = tpu.matmul %43, %52, %cst_33 {dimension_numbers = #tpu.dot_dimension_numbers<[1], [0], [0], [1], [0, 0, 1, 1], [], []>} : vector<8x32xbf16>, vector<32x32xbf16>, vector<8x32xf32> -> vector<8x32xf32>
      %c0_34 = arith.constant 0 : index
      %c0_35 = arith.constant 0 : index
      %54 = vector.load %arg6[%c0_34, %c0_35] : memref<1x32xf32, #tpu.memory_space<vmem>>, vector<1x32xf32>
      %55 = vector.shape_cast %54 : vector<1x32xf32> to vector<32xf32>
      %56 = vector.shape_cast %55 : vector<32xf32> to vector<1x32xf32>
      %57 = vector.broadcast %56 : vector<1x32xf32> to vector<8x32xf32>
      %58 = arith.addf %53, %57 : vector<8x32xf32>
      %59 = arith.addf %58, %42 : vector<8x32xf32>
      %c0_36 = arith.constant 0 : index
      %c0_37 = arith.constant 0 : index
      %60 = vector.load %arg7[%c0_36, %c0_37] : memref<1x32xf32, #tpu.memory_space<vmem>>, vector<1x32xf32>
      %61 = vector.shape_cast %60 : vector<1x32xf32> to vector<32xf32>
      %62 = vector.shape_cast %61 : vector<32xf32> to vector<1x32xf32>
      %63 = vector.broadcast %62 : vector<1x32xf32> to vector<8x32xf32>
      %64 = arith.mulf %59, %63 : vector<8x32xf32>
      %65 = arith.addf %51, %64 : vector<8x32xf32>
      %c0_38 = arith.constant 0 : index
      %c0_39 = arith.constant 0 : index
      %66 = vector.load %arg8[%c0_38, %c0_39] : memref<1x32xf32, #tpu.memory_space<vmem>>, vector<1x32xf32>
      %67 = vector.shape_cast %66 : vector<1x32xf32> to vector<32xf32>
      %68 = vector.shape_cast %67 : vector<32xf32> to vector<1x32xf32>
      %69 = vector.broadcast %68 : vector<1x32xf32> to vector<8x32xf32>
      %70 = arith.mulf %59, %69 : vector<8x32xf32>
      %71 = arith.mulf %65, %65 : vector<8x32xf32>
      %72 = arith.mulf %70, %70 : vector<8x32xf32>
      %73 = arith.addf %71, %72 : vector<8x32xf32>
      %cst_40 = arith.constant 9.99999993E-9 : f32
      %74 = vector.broadcast %cst_40 : f32 to vector<8x32xf32>
      %75 = arith.addf %73, %74 : vector<8x32xf32>
      %76 = math.rsqrt %75 : vector<8x32xf32>
      %77 = arith.mulf %65, %76 : vector<8x32xf32>
      %c1 = arith.constant 1 : index
      %c0_41 = arith.constant 0 : index
      %78 = vector.load %arg9[%c1, %c0_41] : memref<6x32xf32, #tpu.memory_space<vmem>>, vector<1x32xf32>
      %79 = vector.shape_cast %78 : vector<1x32xf32> to vector<32xf32>
      %c1_42 = arith.constant 1 : index
      %c0_43 = arith.constant 0 : index
      %80 = vector.load %arg10[%c1_42, %c0_43] : memref<6x32xf32, #tpu.memory_space<vmem>>, vector<1x32xf32>
      %81 = vector.shape_cast %80 : vector<1x32xf32> to vector<32xf32>
      %cst_44 = arith.constant dense<0.000000e+00> : vector<8xf32>
      %82 = vector.multi_reduction <add>, %77, %cst_44 [1] : vector<8x32xf32> to vector<8xf32>
      %83 = vector.shape_cast %82 : vector<8xf32> to vector<8x1xf32>
      %cst_45 = arith.constant 3.200000e+01 : f32
      %84 = vector.broadcast %cst_45 : f32 to vector<8x1xf32>
      %85 = arith.divf %83, %84 : vector<8x1xf32>
      %86 = vector.broadcast %85 : vector<8x1xf32> to vector<8x32xf32>
      %87 = arith.subf %77, %86 : vector<8x32xf32>
      %88 = arith.mulf %87, %87 : vector<8x32xf32>
      %cst_46 = arith.constant dense<0.000000e+00> : vector<8xf32>
      %89 = vector.multi_reduction <add>, %88, %cst_46 [1] : vector<8x32xf32> to vector<8xf32>
      %90 = vector.shape_cast %89 : vector<8xf32> to vector<8x1xf32>
      %cst_47 = arith.constant 3.200000e+01 : f32
      %91 = vector.broadcast %cst_47 : f32 to vector<8x1xf32>
      %92 = arith.divf %90, %91 : vector<8x1xf32>
      %cst_48 = arith.constant 9.99999974E-6 : f32
      %93 = vector.broadcast %cst_48 : f32 to vector<8x1xf32>
      %94 = arith.addf %92, %93 : vector<8x1xf32>
      %95 = math.rsqrt %94 : vector<8x1xf32>
      %96 = vector.broadcast %95 : vector<8x1xf32> to vector<8x32xf32>
      %97 = arith.mulf %87, %96 : vector<8x32xf32>
      %98 = vector.shape_cast %79 : vector<32xf32> to vector<1x32xf32>
      %99 = vector.broadcast %98 : vector<1x32xf32> to vector<8x32xf32>
      %100 = arith.mulf %97, %99 : vector<8x32xf32>
      %101 = vector.shape_cast %81 : vector<32xf32> to vector<1x32xf32>
      %102 = vector.broadcast %101 : vector<1x32xf32> to vector<8x32xf32>
      %103 = arith.addf %100, %102 : vector<8x32xf32>
      %104 = arith.mulf %70, %76 : vector<8x32xf32>
      %c1_49 = arith.constant 1 : index
      %c0_50 = arith.constant 0 : index
      %105 = vector.load %arg9[%c1_49, %c0_50] : memref<6x32xf32, #tpu.memory_space<vmem>>, vector<1x32xf32>
      %106 = vector.shape_cast %105 : vector<1x32xf32> to vector<32xf32>
      %c1_51 = arith.constant 1 : index
      %c0_52 = arith.constant 0 : index
      %107 = vector.load %arg10[%c1_51, %c0_52] : memref<6x32xf32, #tpu.memory_space<vmem>>, vector<1x32xf32>
      %108 = vector.shape_cast %107 : vector<1x32xf32> to vector<32xf32>
      %cst_53 = arith.constant dense<0.000000e+00> : vector<8xf32>
      %109 = vector.multi_reduction <add>, %104, %cst_53 [1] : vector<8x32xf32> to vector<8xf32>
      %110 = vector.shape_cast %109 : vector<8xf32> to vector<8x1xf32>
      %cst_54 = arith.constant 3.200000e+01 : f32
      %111 = vector.broadcast %cst_54 : f32 to vector<8x1xf32>
      %112 = arith.divf %110, %111 : vector<8x1xf32>
      %113 = vector.broadcast %112 : vector<8x1xf32> to vector<8x32xf32>
      %114 = arith.subf %104, %113 : vector<8x32xf32>
      %115 = arith.mulf %114, %114 : vector<8x32xf32>
      %cst_55 = arith.constant dense<0.000000e+00> : vector<8xf32>
      %116 = vector.multi_reduction <add>, %115, %cst_55 [1] : vector<8x32xf32> to vector<8xf32>
      %117 = vector.shape_cast %116 : vector<8xf32> to vector<8x1xf32>
      %cst_56 = arith.constant 3.200000e+01 : f32
      %118 = vector.broadcast %cst_56 : f32 to vector<8x1xf32>
      %119 = arith.divf %117, %118 : vector<8x1xf32>
      %cst_57 = arith.constant 9.99999974E-6 : f32
      %120 = vector.broadcast %cst_57 : f32 to vector<8x1xf32>
      %121 = arith.addf %119, %120 : vector<8x1xf32>
      %122 = math.rsqrt %121 : vector<8x1xf32>
      %123 = vector.broadcast %122 : vector<8x1xf32> to vector<8x32xf32>
      %124 = arith.mulf %114, %123 : vector<8x32xf32>
      %125 = vector.shape_cast %106 : vector<32xf32> to vector<1x32xf32>
      %126 = vector.broadcast %125 : vector<1x32xf32> to vector<8x32xf32>
      %127 = arith.mulf %124, %126 : vector<8x32xf32>
      %128 = vector.shape_cast %108 : vector<32xf32> to vector<1x32xf32>
      %129 = vector.broadcast %128 : vector<1x32xf32> to vector<8x32xf32>
      %130 = arith.addf %127, %129 : vector<8x32xf32>
      %cst_58 = arith.constant dense<0.000000e+00> : vector<8xf32>
      %131 = vector.multi_reduction <add>, %103, %cst_58 [1] : vector<8x32xf32> to vector<8xf32>
      %132 = vector.shape_cast %131 : vector<8xf32> to vector<8x1xf32>
      %cst_59 = arith.constant 3.200000e+01 : f32
      %133 = vector.broadcast %cst_59 : f32 to vector<8x1xf32>
      %134 = arith.divf %132, %133 : vector<8x1xf32>
      %135 = vector.broadcast %134 : vector<8x1xf32> to vector<8x32xf32>
      %136 = arith.subf %103, %135 : vector<8x32xf32>
      %137 = arith.mulf %136, %136 : vector<8x32xf32>
      %cst_60 = arith.constant dense<0.000000e+00> : vector<8xf32>
      %138 = vector.multi_reduction <add>, %137, %cst_60 [1] : vector<8x32xf32> to vector<8xf32>
      %139 = vector.shape_cast %138 : vector<8xf32> to vector<8x1xf32>
      %cst_61 = arith.constant 3.200000e+01 : f32
      %140 = vector.broadcast %cst_61 : f32 to vector<8x1xf32>
      %141 = arith.divf %139, %140 : vector<8x1xf32>
      %cst_62 = arith.constant 9.99999974E-6 : f32
      %142 = vector.broadcast %cst_62 : f32 to vector<8x1xf32>
      %143 = arith.addf %141, %142 : vector<8x1xf32>
      %144 = math.rsqrt %143 : vector<8x1xf32>
      %145 = vector.broadcast %144 : vector<8x1xf32> to vector<8x32xf32>
      %146 = arith.mulf %136, %145 : vector<8x32xf32>
      %147 = vector.shape_cast %146 : vector<8x32xf32> to vector<1x8x32xf32>
      %cst_63 = arith.constant dense<0.000000e+00> : vector<8xf32>
      %148 = vector.multi_reduction <add>, %130, %cst_63 [1] : vector<8x32xf32> to vector<8xf32>
      %149 = vector.shape_cast %148 : vector<8xf32> to vector<8x1xf32>
      %cst_64 = arith.constant 3.200000e+01 : f32
      %150 = vector.broadcast %cst_64 : f32 to vector<8x1xf32>
      %151 = arith.divf %149, %150 : vector<8x1xf32>
      %152 = vector.broadcast %151 : vector<8x1xf32> to vector<8x32xf32>
      %153 = arith.subf %130, %152 : vector<8x32xf32>
      %154 = arith.mulf %153, %153 : vector<8x32xf32>
      %cst_65 = arith.constant dense<0.000000e+00> : vector<8xf32>
      %155 = vector.multi_reduction <add>, %154, %cst_65 [1] : vector<8x32xf32> to vector<8xf32>
      %156 = vector.shape_cast %155 : vector<8xf32> to vector<8x1xf32>
      %cst_66 = arith.constant 3.200000e+01 : f32
      %157 = vector.broadcast %cst_66 : f32 to vector<8x1xf32>
      %158 = arith.divf %156, %157 : vector<8x1xf32>
      %cst_67 = arith.constant 9.99999974E-6 : f32
      %159 = vector.broadcast %cst_67 : f32 to vector<8x1xf32>
      %160 = arith.addf %158, %159 : vector<8x1xf32>
      %161 = math.rsqrt %160 : vector<8x1xf32>
      %162 = vector.broadcast %161 : vector<8x1xf32> to vector<8x32xf32>
      %163 = arith.mulf %153, %162 : vector<8x32xf32>
      %164 = vector.shape_cast %163 : vector<8x32xf32> to vector<1x8x32xf32>
      %c2 = arith.constant 2 : index
      %c0_68 = arith.constant 0 : index
      %165 = vector.load %arg10[%c2, %c0_68] : memref<6x32xf32, #tpu.memory_space<vmem>>, vector<1x32xf32>
      %166 = vector.shape_cast %165 : vector<1x32xf32> to vector<32xf32>
      %167 = vector.shape_cast %166 : vector<32xf32> to vector<1x32xf32>
      %cst_69 = arith.constant dense<0.000000e+00> : vector<1xf32>
      %168 = vector.multi_reduction <add>, %167, %cst_69 [1] : vector<1x32xf32> to vector<1xf32>
      %169 = vector.shape_cast %168 : vector<1xf32> to vector<1x1xf32>
      %170 = vector.extract %169[0, 0] : f32 from vector<1x1xf32>
      %c3 = arith.constant 3 : index
      %c0_70 = arith.constant 0 : index
      %171 = vector.load %arg10[%c3, %c0_70] : memref<6x32xf32, #tpu.memory_space<vmem>>, vector<1x32xf32>
      %172 = vector.shape_cast %171 : vector<1x32xf32> to vector<32xf32>
      %173 = vector.shape_cast %172 : vector<32xf32> to vector<1x32xf32>
      %cst_71 = arith.constant dense<0.000000e+00> : vector<1xf32>
      %174 = vector.multi_reduction <add>, %173, %cst_71 [1] : vector<1x32xf32> to vector<1xf32>
      %175 = vector.shape_cast %174 : vector<1xf32> to vector<1x1xf32>
      %176 = vector.extract %175[0, 0] : f32 from vector<1x1xf32>
      %177 = arith.subf %170, %176 : f32
      %cst_72 = arith.constant 9.99999993E-9 : f32
      %178 = arith.addf %177, %cst_72 : f32
      %c2_73 = arith.constant 2 : index
      %c0_74 = arith.constant 0 : index
      %179 = vector.load %arg9[%c2_73, %c0_74] : memref<6x32xf32, #tpu.memory_space<vmem>>, vector<1x32xf32>
      %180 = vector.shape_cast %179 : vector<1x32xf32> to vector<32xf32>
      %181 = vector.shape_cast %180 : vector<32xf32> to vector<1x1x32xf32>
      %182 = vector.broadcast %181 : vector<1x1x32xf32> to vector<1x8x32xf32>
      %183 = arith.mulf %147, %182 : vector<1x8x32xf32>
      %cst_75 = arith.constant dense<0.000000e+00> : vector<1x8xf32>
      %184 = vector.multi_reduction <add>, %183, %cst_75 [2] : vector<1x8x32xf32> to vector<1x8xf32>
      %185 = vector.shape_cast %184 : vector<1x8xf32> to vector<1x8x1xf32>
      %c2_76 = arith.constant 2 : index
      %c0_77 = arith.constant 0 : index
      %186 = vector.load %arg9[%c2_76, %c0_77] : memref<6x32xf32, #tpu.memory_space<vmem>>, vector<1x32xf32>
      %187 = vector.shape_cast %186 : vector<1x32xf32> to vector<32xf32>
      %188 = vector.shape_cast %187 : vector<32xf32> to vector<1x1x32xf32>
      %189 = vector.broadcast %188 : vector<1x1x32xf32> to vector<1x8x32xf32>
      %190 = arith.mulf %164, %189 : vector<1x8x32xf32>
      %cst_78 = arith.constant dense<0.000000e+00> : vector<1x8xf32>
      %191 = vector.multi_reduction <add>, %190, %cst_78 [2] : vector<1x8x32xf32> to vector<1x8xf32>
      %192 = vector.shape_cast %191 : vector<1x8xf32> to vector<1x8x1xf32>
      %c3_79 = arith.constant 3 : index
      %c0_80 = arith.constant 0 : index
      %193 = vector.load %arg9[%c3_79, %c0_80] : memref<6x32xf32, #tpu.memory_space<vmem>>, vector<1x32xf32>
      %194 = vector.shape_cast %193 : vector<1x32xf32> to vector<32xf32>
      %195 = vector.shape_cast %194 : vector<32xf32> to vector<1x1x32xf32>
      %196 = vector.broadcast %195 : vector<1x1x32xf32> to vector<1x8x32xf32>
      %197 = arith.mulf %147, %196 : vector<1x8x32xf32>
      %cst_81 = arith.constant dense<0.000000e+00> : vector<1x8xf32>
      %198 = vector.multi_reduction <add>, %197, %cst_81 [2] : vector<1x8x32xf32> to vector<1x8xf32>
      %c3_82 = arith.constant 3 : index
      %c0_83 = arith.constant 0 : index
      %199 = vector.load %arg9[%c3_82, %c0_83] : memref<6x32xf32, #tpu.memory_space<vmem>>, vector<1x32xf32>
      %200 = vector.shape_cast %199 : vector<1x32xf32> to vector<32xf32>
      %201 = vector.shape_cast %200 : vector<32xf32> to vector<1x1x32xf32>
      %202 = vector.broadcast %201 : vector<1x1x32xf32> to vector<1x8x32xf32>
      %203 = arith.mulf %164, %202 : vector<1x8x32xf32>
      %cst_84 = arith.constant dense<0.000000e+00> : vector<1x8xf32>
      %204 = vector.multi_reduction <add>, %203, %cst_84 [2] : vector<1x8x32xf32> to vector<1x8xf32>
      %205 = vector.shape_cast %198 : vector<1x8xf32> to vector<1x1x8xf32>
      %206 = vector.broadcast %185 : vector<1x8x1xf32> to vector<1x8x8xf32>
      %207 = vector.broadcast %205 : vector<1x1x8xf32> to vector<1x8x8xf32>
      %208 = arith.subf %206, %207 : vector<1x8x8xf32>
      %209 = vector.broadcast %178 : f32 to vector<1x8x8xf32>
      %210 = arith.addf %208, %209 : vector<1x8x8xf32>
      %211 = vector.shape_cast %204 : vector<1x8xf32> to vector<1x1x8xf32>
      %212 = vector.broadcast %192 : vector<1x8x1xf32> to vector<1x8x8xf32>
      %213 = vector.broadcast %211 : vector<1x1x8xf32> to vector<1x8x8xf32>
      %214 = arith.subf %212, %213 : vector<1x8x8xf32>
      %215 = vector.broadcast %178 : f32 to vector<1x8x8xf32>
      %216 = arith.addf %214, %215 : vector<1x8x8xf32>
      %217 = arith.mulf %210, %210 : vector<1x8x8xf32>
      %218 = arith.mulf %216, %216 : vector<1x8x8xf32>
      %219 = arith.addf %217, %218 : vector<1x8x8xf32>
      %220 = math.rsqrt %219 : vector<1x8x8xf32>
      %221 = arith.mulf %210, %220 : vector<1x8x8xf32>
      %cst_85 = arith.constant 1.000000e+01 : f32
      %222 = vector.broadcast %cst_85 : f32 to vector<1x8x8xf32>
      %223 = arith.mulf %221, %222 : vector<1x8x8xf32>
      %cst_86 = arith.constant dense<0xFF800000> : vector<1x8xf32>
      %224 = vector.multi_reduction <maximumf>, %223, %cst_86 [2] : vector<1x8x8xf32> to vector<1x8xf32>
      %225 = vector.shape_cast %224 : vector<1x8xf32> to vector<1x8x1xf32>
      %226 = vector.broadcast %225 : vector<1x8x1xf32> to vector<1x8x8xf32>
      %227 = arith.subf %223, %226 : vector<1x8x8xf32>
      %228 = math.exp %227 : vector<1x8x8xf32>
      %cst_87 = arith.constant dense<0.000000e+00> : vector<1x8xf32>
      %229 = vector.multi_reduction <add>, %228, %cst_87 [2] : vector<1x8x8xf32> to vector<1x8xf32>
      %230 = vector.shape_cast %229 : vector<1x8xf32> to vector<1x8x1xf32>
      %231 = tpu.reciprocal %230 {approx = true} : vector<1x8x1xf32> -> vector<1x8x1xf32>
      %232 = vector.broadcast %231 : vector<1x8x1xf32> to vector<1x8x8xf32>
      %233 = arith.mulf %228, %232 : vector<1x8x8xf32>
      %234 = arith.truncf %233 : vector<1x8x8xf32> to vector<1x8x8xbf16>
      %c4 = arith.constant 4 : index
      %c0_88 = arith.constant 0 : index
      %235 = vector.load %arg9[%c4, %c0_88] : memref<6x32xf32, #tpu.memory_space<vmem>>, vector<1x32xf32>
      %236 = vector.shape_cast %235 : vector<1x32xf32> to vector<32xf32>
      %237 = vector.shape_cast %236 : vector<32xf32> to vector<1x1x32xf32>
      %238 = vector.broadcast %237 : vector<1x1x32xf32> to vector<1x8x32xf32>
      %239 = arith.mulf %147, %238 : vector<1x8x32xf32>
      %c4_89 = arith.constant 4 : index
      %c0_90 = arith.constant 0 : index
      %240 = vector.load %arg10[%c4_89, %c0_90] : memref<6x32xf32, #tpu.memory_space<vmem>>, vector<1x32xf32>
      %241 = vector.shape_cast %240 : vector<1x32xf32> to vector<32xf32>
      %242 = vector.shape_cast %241 : vector<32xf32> to vector<1x1x32xf32>
      %243 = vector.broadcast %242 : vector<1x1x32xf32> to vector<1x8x32xf32>
      %244 = arith.addf %239, %243 : vector<1x8x32xf32>
      %245 = arith.truncf %244 : vector<1x8x32xf32> to vector<1x8x32xbf16>
      %c4_91 = arith.constant 4 : index
      %c0_92 = arith.constant 0 : index
      %246 = vector.load %arg9[%c4_91, %c0_92] : memref<6x32xf32, #tpu.memory_space<vmem>>, vector<1x32xf32>
      %247 = vector.shape_cast %246 : vector<1x32xf32> to vector<32xf32>
      %248 = vector.shape_cast %247 : vector<32xf32> to vector<1x1x32xf32>
      %249 = vector.broadcast %248 : vector<1x1x32xf32> to vector<1x8x32xf32>
      %250 = arith.mulf %164, %249 : vector<1x8x32xf32>
      %c4_93 = arith.constant 4 : index
      %c0_94 = arith.constant 0 : index
      %251 = vector.load %arg10[%c4_93, %c0_94] : memref<6x32xf32, #tpu.memory_space<vmem>>, vector<1x32xf32>
      %252 = vector.shape_cast %251 : vector<1x32xf32> to vector<32xf32>
      %253 = vector.shape_cast %252 : vector<32xf32> to vector<1x1x32xf32>
      %254 = vector.broadcast %253 : vector<1x1x32xf32> to vector<1x8x32xf32>
      %255 = arith.addf %250, %254 : vector<1x8x32xf32>
      %256 = arith.truncf %255 : vector<1x8x32xf32> to vector<1x8x32xbf16>
      "tpu.trace_start"() <{level = 10 : i32, message = "bqk,bkd->bqd"}> : () -> ()
      %cst_95 = arith.constant dense<0.000000e+00> : vector<1x8x32xf32>
      %257 = tpu.matmul %234, %245, %cst_95 {dimension_numbers = #tpu.dot_dimension_numbers<[2], [1], [1], [2], [0, 0, 0, 1, 1, 2], [0], [0]>} : vector<1x8x8xbf16>, vector<1x8x32xbf16>, vector<1x8x32xf32> -> vector<1x8x32xf32>
      %cst_96 = arith.constant dense<0.000000e+00> : vector<1x8x32xf32>
      %258 = tpu.matmul %234, %256, %cst_96 {dimension_numbers = #tpu.dot_dimension_numbers<[2], [1], [1], [2], [0, 0, 0, 1, 1, 2], [0], [0]>} : vector<1x8x8xbf16>, vector<1x8x32xbf16>, vector<1x8x32xf32> -> vector<1x8x32xf32>
      "tpu.trace_stop"() : () -> ()
      %259 = vector.shape_cast %257 : vector<1x8x32xf32> to vector<8x32xf32>
      %c5 = arith.constant 5 : index
      %c0_97 = arith.constant 0 : index
      %260 = vector.load %arg9[%c5, %c0_97] : memref<6x32xf32, #tpu.memory_space<vmem>>, vector<1x32xf32>
      %261 = vector.shape_cast %260 : vector<1x32xf32> to vector<32xf32>
      %c5_98 = arith.constant 5 : index
      %c0_99 = arith.constant 0 : index
      %262 = vector.load %arg10[%c5_98, %c0_99] : memref<6x32xf32, #tpu.memory_space<vmem>>, vector<1x32xf32>
      %263 = vector.shape_cast %262 : vector<1x32xf32> to vector<32xf32>
      %cst_100 = arith.constant dense<0.000000e+00> : vector<8xf32>
      %264 = vector.multi_reduction <add>, %259, %cst_100 [1] : vector<8x32xf32> to vector<8xf32>
      %265 = vector.shape_cast %264 : vector<8xf32> to vector<8x1xf32>
      %cst_101 = arith.constant 3.200000e+01 : f32
      %266 = vector.broadcast %cst_101 : f32 to vector<8x1xf32>
      %267 = arith.divf %265, %266 : vector<8x1xf32>
      %268 = vector.broadcast %267 : vector<8x1xf32> to vector<8x32xf32>
      %269 = arith.subf %259, %268 : vector<8x32xf32>
      %270 = arith.mulf %269, %269 : vector<8x32xf32>
      %cst_102 = arith.constant dense<0.000000e+00> : vector<8xf32>
      %271 = vector.multi_reduction <add>, %270, %cst_102 [1] : vector<8x32xf32> to vector<8xf32>
      %272 = vector.shape_cast %271 : vector<8xf32> to vector<8x1xf32>
      %cst_103 = arith.constant 3.200000e+01 : f32
      %273 = vector.broadcast %cst_103 : f32 to vector<8x1xf32>
      %274 = arith.divf %272, %273 : vector<8x1xf32>
      %cst_104 = arith.constant 9.99999974E-6 : f32
      %275 = vector.broadcast %cst_104 : f32 to vector<8x1xf32>
      %276 = arith.addf %274, %275 : vector<8x1xf32>
      %277 = math.rsqrt %276 : vector<8x1xf32>
      %278 = vector.broadcast %277 : vector<8x1xf32> to vector<8x32xf32>
      %279 = arith.mulf %269, %278 : vector<8x32xf32>
      %280 = vector.shape_cast %261 : vector<32xf32> to vector<1x32xf32>
      %281 = vector.broadcast %280 : vector<1x32xf32> to vector<8x32xf32>
      %282 = arith.mulf %279, %281 : vector<8x32xf32>
      %283 = vector.shape_cast %263 : vector<32xf32> to vector<1x32xf32>
      %284 = vector.broadcast %283 : vector<1x32xf32> to vector<8x32xf32>
      %285 = arith.addf %282, %284 : vector<8x32xf32>
      %286 = vector.shape_cast %258 : vector<1x8x32xf32> to vector<8x32xf32>
      %c5_105 = arith.constant 5 : index
      %c0_106 = arith.constant 0 : index
      %287 = vector.load %arg9[%c5_105, %c0_106] : memref<6x32xf32, #tpu.memory_space<vmem>>, vector<1x32xf32>
      %288 = vector.shape_cast %287 : vector<1x32xf32> to vector<32xf32>
      %c5_107 = arith.constant 5 : index
      %c0_108 = arith.constant 0 : index
      %289 = vector.load %arg10[%c5_107, %c0_108] : memref<6x32xf32, #tpu.memory_space<vmem>>, vector<1x32xf32>
      %290 = vector.shape_cast %289 : vector<1x32xf32> to vector<32xf32>
      %cst_109 = arith.constant dense<0.000000e+00> : vector<8xf32>
      %291 = vector.multi_reduction <add>, %286, %cst_109 [1] : vector<8x32xf32> to vector<8xf32>
      %292 = vector.shape_cast %291 : vector<8xf32> to vector<8x1xf32>
      %cst_110 = arith.constant 3.200000e+01 : f32
      %293 = vector.broadcast %cst_110 : f32 to vector<8x1xf32>
      %294 = arith.divf %292, %293 : vector<8x1xf32>
      %295 = vector.broadcast %294 : vector<8x1xf32> to vector<8x32xf32>
      %296 = arith.subf %286, %295 : vector<8x32xf32>
      %297 = arith.mulf %296, %296 : vector<8x32xf32>
      %cst_111 = arith.constant dense<0.000000e+00> : vector<8xf32>
      %298 = vector.multi_reduction <add>, %297, %cst_111 [1] : vector<8x32xf32> to vector<8xf32>
      %299 = vector.shape_cast %298 : vector<8xf32> to vector<8x1xf32>
      %cst_112 = arith.constant 3.200000e+01 : f32
      %300 = vector.broadcast %cst_112 : f32 to vector<8x1xf32>
      %301 = arith.divf %299, %300 : vector<8x1xf32>
      %cst_113 = arith.constant 9.99999974E-6 : f32
      %302 = vector.broadcast %cst_113 : f32 to vector<8x1xf32>
      %303 = arith.addf %301, %302 : vector<8x1xf32>
      %304 = math.rsqrt %303 : vector<8x1xf32>
      %305 = vector.broadcast %304 : vector<8x1xf32> to vector<8x32xf32>
      %306 = arith.mulf %296, %305 : vector<8x32xf32>
      %307 = vector.shape_cast %288 : vector<32xf32> to vector<1x32xf32>
      %308 = vector.broadcast %307 : vector<1x32xf32> to vector<8x32xf32>
      %309 = arith.mulf %306, %308 : vector<8x32xf32>
      %310 = vector.shape_cast %290 : vector<32xf32> to vector<1x32xf32>
      %311 = vector.broadcast %310 : vector<1x32xf32> to vector<8x32xf32>
      %312 = arith.addf %309, %311 : vector<8x32xf32>
      %313 = arith.truncf %285 : vector<8x32xf32> to vector<8x32xbf16>
      %c0_114 = arith.constant 0 : index
      %c0_115 = arith.constant 0 : index
      %314 = vector.load %arg15[%c0_114, %c0_115] : memref<8x32xbf16, #tpu.memory_space<vmem>>, vector<8x32xbf16>
      tpu.vector_store %arg15[%c0_114, %c0_115], %313 {strides = array<i32>} : memref<8x32xbf16, #tpu.memory_space<vmem>>, vector<8x32xbf16>,
      %315 = arith.truncf %312 : vector<8x32xf32> to vector<8x32xbf16>
      %c0_116 = arith.constant 0 : index
      %c0_117 = arith.constant 0 : index
      %316 = vector.load %arg16[%c0_116, %c0_117] : memref<8x32xbf16, #tpu.memory_space<vmem>>, vector<8x32xbf16>
      tpu.vector_store %arg16[%c0_116, %c0_117], %315 {strides = array<i32>} : memref<8x32xbf16, #tpu.memory_space<vmem>>, vector<8x32xbf16>,
    } else {
    }
    %c0 = arith.constant 0 : index
    %c0_1 = arith.constant 0 : index
    %3 = vector.load %arg15[%c0, %c0_1] : memref<8x32xbf16, #tpu.memory_space<vmem>>, vector<8x32xbf16>
    %c0_2 = arith.constant 0 : index
    %c0_3 = arith.constant 0 : index
    %4 = vector.load %arg11[%c0_2, %c0_3] : memref<32x128xbf16, #tpu.memory_space<vmem>>, vector<32x128xbf16>
    %cst = arith.constant dense<0.000000e+00> : vector<8x128xf32>
    %5 = tpu.matmul %3, %4, %cst {dimension_numbers = #tpu.dot_dimension_numbers<[1], [0], [0], [1], [0, 0, 1, 1], [], []>} : vector<8x32xbf16>, vector<32x128xbf16>, vector<8x128xf32> -> vector<8x128xf32>
    %c0_4 = arith.constant 0 : index
    %c0_5 = arith.constant 0 : index
    %6 = vector.load %arg16[%c0_4, %c0_5] : memref<8x32xbf16, #tpu.memory_space<vmem>>, vector<8x32xbf16>
    %c0_6 = arith.constant 0 : index
    %c0_7 = arith.constant 0 : index
    %7 = vector.load %arg12[%c0_6, %c0_7] : memref<32x128xbf16, #tpu.memory_space<vmem>>, vector<32x128xbf16>
    %cst_8 = arith.constant dense<0.000000e+00> : vector<8x128xf32>
    %8 = tpu.matmul %6, %7, %cst_8 {dimension_numbers = #tpu.dot_dimension_numbers<[1], [0], [0], [1], [0, 0, 1, 1], [], []>} : vector<8x32xbf16>, vector<32x128xbf16>, vector<8x128xf32> -> vector<8x128xf32>
    %9 = arith.addf %5, %8 : vector<8x128xf32>
    %c0_9 = arith.constant 0 : index
    %c0_10 = arith.constant 0 : index
    %10 = vector.load %arg13[%c0_9, %c0_10] : memref<1x128xf32, #tpu.memory_space<vmem>>, vector<1x128xf32>
    %11 = vector.broadcast %10 : vector<1x128xf32> to vector<8x128xf32>
    %12 = arith.addf %9, %11 : vector<8x128xf32>
    %13 = vector.shape_cast %12 : vector<8x128xf32> to vector<1x8x128xf32>
    %c0_11 = arith.constant 0 : index
    %c0_12 = arith.constant 0 : index
    %c0_13 = arith.constant 0 : index
    %14 = vector.load %arg14[%c0_11, %c0_12, %c0_13] : memref<1x8x128xf32, #tpu.memory_space<vmem>>, vector<1x8x128xf32>
    tpu.vector_store %arg14[%c0_11, %c0_12, %c0_13], %13 {strides = array<i32>} : memref<1x8x128xf32, #tpu.memory_space<vmem>>, vector<1x8x128xf32>,
    return
  }
  func.func @transform_0(%arg0: i32, %arg1: i32) -> (i32, i32, i32) {
    %c0_i32 = arith.constant 0 : i32
    %c0_i32_0 = arith.constant 0 : i32
    %c0_i32_1 = arith.constant 0 : i32
    return %arg0, %c0_i32, %c0_i32_0 : i32, i32, i32
  }
  func.func @transform_1(%arg0: i32, %arg1: i32) -> (i32, i32) {
    %c0_i32 = arith.constant 0 : i32
    %c0_i32_0 = arith.constant 0 : i32
    %c0_i32_1 = arith.constant 0 : i32
    return %c0_i32, %c0_i32_0 : i32, i32
  }
  func.func @transform_2(%arg0: i32, %arg1: i32) -> (i32, i32) {
    %c0_i32 = arith.constant 0 : i32
    %c0_i32_0 = arith.constant 0 : i32
    %c0_i32_1 = arith.constant 0 : i32
    return %c0_i32, %c0_i32_0 : i32, i32
  }
  func.func @transform_3(%arg0: i32, %arg1: i32) -> (i32, i32) {
    %c0_i32 = arith.constant 0 : i32
    %c0_i32_0 = arith.constant 0 : i32
    %c0_i32_1 = arith.constant 0 : i32
    return %c0_i32, %c0_i32_0 : i32, i32
  }
  func.func @transform_4(%arg0: i32, %arg1: i32) -> (i32, i32) {
    %c0_i32 = arith.constant 0 : i32
    %c0_i32_0 = arith.constant 0 : i32
    %c0_i32_1 = arith.constant 0 : i32
    return %c0_i32, %c0_i32_0 : i32, i32
  }
  func.func @transform_5(%arg0: i32, %arg1: i32) -> (i32, i32) {
    %c0_i32 = arith.constant 0 : i32
    %c0_i32_0 = arith.constant 0 : i32
    %c0_i32_1 = arith.constant 0 : i32
    return %c0_i32, %c0_i32_0 : i32, i32
  }
  func.func @transform_6(%arg0: i32, %arg1: i32) -> (i32, i32) {
    %c0_i32 = arith.constant 0 : i32
    %c0_i32_0 = arith.constant 0 : i32
    %c0_i32_1 = arith.constant 0 : i32
    return %c0_i32, %c0_i32_0 : i32, i32
  }
  func.func @transform_7(%arg0: i32, %arg1: i32) -> (i32, i32) {
    %c0_i32 = arith.constant 0 : i32
    %c0_i32_0 = arith.constant 0 : i32
    %c0_i32_1 = arith.constant 0 : i32
    return %c0_i32, %c0_i32_0 : i32, i32
  }
  func.func @transform_8(%arg0: i32, %arg1: i32) -> (i32, i32) {
    %c0_i32 = arith.constant 0 : i32
    %c0_i32_0 = arith.constant 0 : i32
    %c0_i32_1 = arith.constant 0 : i32
    return %c0_i32, %c0_i32_0 : i32, i32
  }
  func.func @transform_9(%arg0: i32, %arg1: i32) -> (i32, i32) {
    %c0_i32 = arith.constant 0 : i32
    %c0_i32_0 = arith.constant 0 : i32
    return %c0_i32, %arg1 : i32, i32
  }
  func.func @transform_10(%arg0: i32, %arg1: i32) -> (i32, i32) {
    %c0_i32 = arith.constant 0 : i32
    %c0_i32_0 = arith.constant 0 : i32
    return %c0_i32, %arg1 : i32, i32
  }
  func.func @transform_11(%arg0: i32, %arg1: i32) -> (i32, i32) {
    %c0_i32 = arith.constant 0 : i32
    %c0_i32_0 = arith.constant 0 : i32
    return %c0_i32, %arg1 : i32, i32
  }
  func.func @transform_12(%arg0: i32, %arg1: i32) -> (i32, i32, i32) {
    %c0_i32 = arith.constant 0 : i32
    %c0_i32_0 = arith.constant 0 : i32
    return %arg0, %c0_i32, %arg1 : i32, i32, i32
  }
}

</mosaic_0001>

<bundles_post_ra>
// kernel: tpu_custom_call.1
= control target key start
LH: loop header
LB: loop body
LE: loop exit
PB: predicated region body
PF: predicated region fallthrough
CT: control target
= control target key end

     0   :  { %s2118_s0 = inlined_call_operand.hbm [shape: f32[2,8,32], index: 0, kind: input, shape index: {}]   ;;  %s2119_s1 = inlined_call_operand.hbm [shape: bf16[32,32], index: 1, kind: input, shape index: {}]   ;;  %s2120_s2 = inlined_call_operand.vmem [shape: f32[1,32], index: 2, kind: input, shape index: {}]   ;;  %s2121_s3 = inlined_call_operand.hbm [shape: bf16[32,32], index: 3, kind: input, shape index: {}]   ;;  %s2122_s4 = inlined_call_operand.vmem [shape: f32[1,32], index: 4, kind: input, shape index: {}]   ;;  %s2123_s5 = inlined_call_operand.vmem [shape: f32[1,32], index: 5, kind: input, shape index: {}]   ;;  %s2124_s6 = inlined_call_operand.vmem [shape: f32[1,32], index: 6, kind: input, shape index: {}]   ;;  %s2125_s7 = inlined_call_operand.hbm [shape: f32[6,32], index: 7, kind: input, shape index: {}]   ;;  %s2126_s8 = inlined_call_operand.hbm [shape: f32[6,32], index: 8, kind: input, shape index: {}]   ;;  %s2127_s9 = inlined_call_operand.hbm [shape: bf16[32,128], index: 9, kind: input, shape index: {}]   ;;  %s2128_s10 = inlined_call_operand.hbm [shape: bf16[32,128], index: 10, kind: input, shape index: {}]   ;;  %s2129_s11 = inlined_call_operand.vmem [shape: f32[1,128], index: 11, kind: input, shape index: {}]   ;;  %s2130_s12 = inlined_call_operand.hbm [shape: f32[2,8,128], index: 12, kind: output, shape index: {}]  }
   0x1   :  { %2133 = sst [smem:[#allocation23_spill]] %s2118_s0 }
   0x2   :  { %2134 = sst [smem:[#allocation24_spill]] %s2119_s1 }
   0x3   :  { %2135 = sst [smem:[#allocation25_spill]] %s2124_s6 }
   0x4   :  { %2136 = sst [smem:[#allocation26_spill]] %s2125_s7 }
   0x5   :  { %2137 = sst [smem:[#allocation27_spill]] %s2129_s11 }
   0x6   :  { %2138 = sst [smem:[#allocation28_spill]] %s2130_s12 }
   0x7   :  { %17 = vsyncpa [#allocation5], 0 }
   0x8   :  { %19 = vsyncpa [#allocation5 + $0x1], 0 }
   0x9   :  { %20 = vsyncpa [#allocation8], 0 }
   0xa   :  { %21 = vsyncpa [#allocation11], 0 }
   0xb   :  { %22 = vsyncpa [#allocation14], 0 }
   0xc   :  { %23 = vsyncpa [#allocation6], 0 }
   0xd   :  { %25 = vsyncpa [#allocation6 + $0x1], 0  ;;  %s1863_s21 = smov 0   ;;  %s1865_s22 = smov 0  }
   0xe   :  { %s1867_s23 = smov 0   ;;  %s1869_s24 = smov 0  }
   0xf   :  { %s1871_s25 = smov 0   ;;  %s1873_s26 = smov 0  }
  0x10 LB: > { %2139 = sst [smem:[#allocation22_spill]] %s1779_s24  ;;  %s2131_s27 = sadd.s32 4294967295, %s1787_s26   ;;  %s1787_s26 = sphi %s1873_s26, %s31_s26   ;;  %s1783_s25 = sphi %s1871_s25, %s2158_s25   ;;  %s1779_s24 = sphi %s1869_s24, %s2157_s24   ;;  %s1775_s23 = sphi %s1867_s23, %s2156_s23   ;;  %s1771_s22 = sphi %s1865_s22, %s2155_s22   ;;  %s1767_s21 = sphi %s1863_s21, %s2154_s21  }
  0x11   : > { %p1244_p0 = scmp.ge.s32.totalorder %s1787_s26, 1  ;;  %p1897_p1 = scmp.eq.s32.totalorder %s2131_s27, 0 }
  0x12   : > { %p348_p2 = scmp.lt.s32.totalorder %s1787_s26, 3  ;;  %s2141_s1 = sld [smem:[#allocation24_spill]] }
  0x13   : > { %s1789_s15 = smov [#allocation7]   ;;  %p1252_p6 = scmp.ge.s32.totalorder %s1787_s26, 2 }
  0x14   : > { %p1905_p3 = pnand %p1244_p0, %p348_p2  ;;  %s361_s16 = sshll.u32 %s1789_s15, 4  ;;  %s362_s16 = int_to_ptr.vmem [resolvable:$true] %s361_s16 }
  0x15   : > { %s2144_s7 = sld [smem:[#allocation26_spill]]  ;;  %s1790_s29 = smov 64  }
  0x16   : > { %p1346_p4 = pneg %p1905_p3  ;;  %s1791_s30 = smov 4  }
  0x17   : > { %s1792_s15 = smov [#allocation10]   ;;  %s425_s12 = sshll.u32 %s2127_s9, 4  ;;  %s426_s12 = int_to_ptr.hbm [resolvable:$true] %s425_s12 }
  0x18   : > { %s359_s13 = sshll.u32 %s2141_s1, 4  ;;  %p1913_p5 = pnand %p1346_p4, %p1897_p1  ;;  %s360_s13 = int_to_ptr.hbm [resolvable:$true] %s359_s13 }
  0x19   : > { %s402_s27 = sshll.u32 %s1792_s15, 4  ;;  %s1793_s24 = smov [#allocation13]   ;;  %s403_s27 = int_to_ptr.vmem [resolvable:$true] %s402_s27 }
  0x1a   : > { %1349 = dma.hbm_to_vmem [thread:$0]  (!%p1913_p5), %s360_s13, 256, %s362_s16, [#allocation8], %s1790_s29, %s1790_s29, %s1791_s30  }
  0x1b   : > { %s400_s20 = sshll.u32 %s2144_s7, 4  ;;  %s376_s7 = sshll.u32 %s2121_s3, 4  ;;  %s401_s20 = int_to_ptr.hbm [resolvable:$true] %s400_s20  ;;  %s377_s7 = int_to_ptr.hbm [resolvable:$true] %s376_s7 }
  0x1c   : > { %1355 = dma.hbm_to_vmem [thread:$0]  (!%p1913_p5), %s401_s20, 128, %s403_s27, [#allocation11]  }
  0x1d   : > { %s427_s6 = sshll.u32 %s1793_s24, 4  ;;  %s1794_s1 = smov [#allocation9]   ;;  %s428_s6 = int_to_ptr.vmem [resolvable:$true] %s427_s6 }
  0x1e   : > { %1361 = dma.hbm_to_vmem [thread:$0]  (!%p1913_p5), %s426_s12, 256, %s428_s6, [#allocation14], %s1790_s29, %s1790_s29, %s1791_s30  }
  0x1f   : > { %s378_s11 = sshll.u32 %s1794_s1, 4  ;;  %s412_s16 = sshll.u32 %s2126_s8, 4  ;;  %s379_s11 = int_to_ptr.vmem [resolvable:$true] %s378_s11  ;;  %s413_s16 = int_to_ptr.hbm [resolvable:$true] %s412_s16 }
  0x20   : > { %1352 = dma.hbm_to_vmem [thread:$0]  (!%p1913_p5), %s377_s7, 256, %s379_s11, [#allocation8], %s1790_s29, %s1790_s29, %s1791_s30  }
  0x21   : > { %s441_s24 = sshll.u32 %s2128_s10, 4  ;;  %s1795_s20 = smov [#allocation12]   ;;  %s442_s24 = int_to_ptr.hbm [resolvable:$true] %s441_s24 }
  0x22   : > { %s414_s15 = sshll.u32 %s1795_s20, 4  ;;  %s1796_s18 = smov [#allocation15]   ;;  %s415_s15 = int_to_ptr.vmem [resolvable:$true] %s414_s15 }
  0x23   : > { %1358 = dma.hbm_to_vmem [thread:$0]  (!%p1913_p5), %s413_s16, 128, %s415_s15, [#allocation11]  }
  0x24   : > { %s443_s19 = sshll.u32 %s1796_s18, 4  ;;  %s43_s7 = sadd.s32 1, %s1783_s25  ;;  %s444_s19 = int_to_ptr.vmem [resolvable:$true] %s443_s19 }
  0x25   : > { %1364 = dma.hbm_to_vmem [thread:$0]  (!%p1913_p5), %s442_s24, 256, %s444_s19, [#allocation14], %s1790_s29, %s1790_s29, %s1791_s30  }
  0x26   : > { %s1243_s1 = sadd.s32 4294967294, %s1787_s26   ;;  %p45_p7 = scmp.ge.s32.totalorder %s43_s7, 2 }
  0x27   : > { %s50_s11 = sadd.s32 1, %s1775_s23  ;;  %p57_p8 = scmp.ne.s32.totalorder %s1775_s23, %s1771_s22 }
  0x28   : > { %s2160_s7 = smov (%p45_p7, %s43_s7), 0  ;;  %p58_p9 = scmp.eq.s32.totalorder %s1787_s26, 0 }
  0x29   : > { %p63_p10 = scmp.ne.s32.totalorder %s1771_s22, %s1767_s21  ;;  %s47_s13 = ssub.s32 %s1783_s25, %s2160_s7 }
  0x2a   : > { %s2145_s17 = sadd.s32 4294967295, %s1787_s26   ;;  %p48_p12 = scmp.eq.s32.totalorder %s47_s13, 0 }
  0x2b   : > { %p335_p11 = scmp.eq.s32.totalorder %s2145_s17, 1  ;;  %p1973_p13 = por %p1897_p1, %p63_p10 }
  0x2c   : > { %p341_p2 = scmp.eq.s32.totalorder %s1243_s1, 1  ;;  %p59_p4 = por %p58_p9, %p57_p8 }
  0x2d   : > { %p1977_p0 = por %p335_p11, %p57_p8  ;;  %s463_s6 = sand.u32 1, %s1775_s23  }
  0x2e   : > { %s1982_s27 = scalar_select %p48_p12, %s1775_s23, %s50_s11  }
  0x2f   : > { %p1984_p5 = por %p341_p2, %p63_p10  ;;  %s1254_s12 = sshll.u32 %s1783_s25, 3 }
  0x30   : > { %p1379_p7 = scmp.lt.s32.totalorder %s1787_s26, 2  ;;  %s1253_s24 = sshll.u32 %s463_s6, 3 }
  0x31   : > { %s2149_s0 = sld [smem:[#allocation23_spill]]  ;;  %s467_s13 = scalar_lea.vmem [#allocation4], %s1253_s24 }
  0x32   : > { %s475_s17 = sshll.u32 %s467_s13, 4  ;;  %p1366_p11 = pnand %p1379_p7, %p59_p4  ;;  %s476_s17 = int_to_ptr.vmem [resolvable:$true] %s475_s17 }
  0x33   : > { %s464_s1 = scalar_lea.sflag [#allocation5], %s463_s6  ;;  %s1997_s11 = sand.u32 (!%p1905_p3), 1, %s1771_s22  }
  0x34   : > { %s1256_s20 = sshll.u32 (!%p1905_p3), %s1997_s11, 3 }
  0x35   : > { %484 = sbr.rel (%p1905_p3) target bundleno = 1994 (0x7ca), region = 68  ;;  %s490_s24 = scalar_lea.vmem (!%p1905_p3), [#allocation4], %s1256_s20 }
  0x37   : > { %s471_s18 = scalar_lea.hbm %s2149_s0, %s1254_s12  ;;  %s487_s12 = scalar_lea.sflag (!%p1905_p3), [#allocation5], %s1997_s11 }
  0x38   : > { %s473_s19 = sshll.u32 %s471_s18, 4  ;;  %s474_s19 = int_to_ptr.hbm [resolvable:$true] %s473_s19 }
  0x39   : > { %1368 = dma.hbm_to_vmem [thread:$0]  (!%p1366_p11), %s474_s19, 128, %s476_s17, %s464_s1  }
  0x3a   : > { %1746 = dma.done.wait (%p1973_p13), %s487_s12, 128  }
  0x3b   : > { %1748 = vsyncadd (%p1973_p13), %s487_s12, 4294967168 }
  0x3c   : > { %1750 = dma.done.wait (%p1897_p1), [#allocation8], 512  }
  0x3d   : > { %1752 = vsyncadd (%p1897_p1), [#allocation8], 4294966784 }
  0x3e   : > { %1754 = dma.done.wait (%p1897_p1), [#allocation11], 256  }
  0x3f   : > { %1756 = vsyncadd (%p1897_p1), [#allocation11], 4294967040 }
  0x40   : > { %1758 = dma.done.wait (%p1897_p1), [#allocation14], 512  }
  0x41   : > { %1760 = vsyncadd (%p1897_p1), [#allocation14], 4294966784  ;;  %vm576_vm0 = vcmask 261120   ;;  %v573_v0 = vld [vmem:[%s490_s24] sm:$0xff]  ;;  %v1797_v2 = vmov 32.0   ;;  %v1307_v14 = vld [vmem:[#allocation7 + $0x8] sm:$0xff] }
  0x42   : > { %v577_v1 = vsel %vm576_vm0, %v573_v0, 0.0  ;;  %1459 = vrcp.f32 %v1797_v2  ;;  %v1309_v15 = vld [vmem:[#allocation9 + $0x8] sm:$0xff]  ;;  %640 = vmatpush.bf16.msra.mxu0 %v1307_v14  ;;  %v1306_v16 = vld [vmem:[#allocation7] sm:$0xff]  ;;  %v1308_v17 = vld [vmem:[#allocation9] sm:$0xff]  ;;  %s2150_s17 = sld [smem:[#allocation25_spill]]  ;;  %vm806_vm14 = vcmask 253952  }
  0x43   : > { %578 = vadd.xlane.f32.xlu0 %v577_v1  ;;  %674 = vmatpush.bf16.msra.mxu1 %v1309_v15  ;;  %v1444_v27 = vld [vmem:[#allocation10] ss:$0 sm:$0xff]  ;;  %v1445_v30 = vld [vmem:[#allocation12] ss:$0 sm:$0xff]  ;;  %s2151_s14 = sld [smem:[#allocation22_spill]] }
  0x44   : > { %v1446_v34 = vld [vmem:[%s2120_s2] ss:$0 sm:$0xff]  ;;  %s2152_s18 = sld [smem:[#allocation28_spill]] }
  0x45   : > { %v1447_v35 = vld [vmem:[%s2122_s4] ss:$0 sm:$0xff] }
  0x46   : > { %641 = vmatpush.bf16.msra.mxu0 %v1306_v16  ;;  %v1448_v40 = vld [vmem:[%s2123_s5] ss:$0 sm:$0xff] }
  0x47   : > { %675 = vmatpush.bf16.msra.mxu1 %v1308_v17 }
  0x48   : > { %v1460_v3 = vpop.eup %1459  ;;  %v1449_v41 = vld [vmem:[%s2150_s17] ss:$0 sm:$0xff] }
  0x49   : > { %v581_v4 = vmul.f32 32.0, %v1460_v3  ;;  %vm585_vm1 = vweird.f32 %v1460_v3  ;;  %s1303_s29 = sshll.u32 %s2151_s14, 3  ;;  %s1074_s14 = scalar_lea.sflag [#allocation6], %s1997_s11 }
  0x4a   : > { %s1085_s19 = scalar_lea.hbm %s2152_s18, %s1303_s29  ;;  %s1713_s13 = scalar_lea.hbm %s2152_s18, 16 }
  0x4b   : > { %v582_v5 = vsub.f32 1.0, %v581_v4 }
  0x4d   : > { %v583_v6 = vmul.f32 %v1460_v3, %v582_v5 }
  0x4f   : > { %v584_v7 = vadd.f32 %v1460_v3, %v583_v6 }
  0x51   : > { %v2020_v8 = vsel %vm585_vm1, %v1460_v3, %v584_v7 }
  0xb6   : > { %v579_v9 = vpop.xlane.xlu0 %578 }
  0xb7   : > { %v587_v10 = vmul.f32 %v2020_v8, %v579_v9 }
  0xb9   : > { %v588_v11 = vsub.f32 %v573_v0, %v587_v10 }
  0xbb   : > { %v589_v12 = vmul.f32 %v588_v11, %v588_v11 }
  0xbd   : > { %v590_v13 = vsel %vm576_vm0, %v589_v12, 0.0 }
  0xbe   : > { %591 = vadd.xlane.f32.xlu0 %v590_v13 }
 0x131   : > { %v592_v18 = vpop.xlane.xlu0 %591 }
 0x132   : > { %v593_v19 = vmul.f32 %v592_v18, %v2020_v8 }
 0x134   : > { %v594_v20 = vadd.f32 1e-05, %v593_v19 }
 0x136   : > { %1461 = vrsqrt.f32 %v594_v20  ;;  %vm601_vm3 = vweird.f32 %v594_v20 }
 0x13c   : > { %v1462_v21 = vpop.eup %1461 }
 0x13d   : > { %v596_v22 = vmul.f32 %v1462_v21, %v594_v20  ;;  %vm602_vm2 = vweird.f32 %v1462_v21 }
 0x13e   : > { %vm603_vm4 = vmor %vm601_vm3, %vm602_vm2 }
 0x13f   : > { %v597_v23 = vmul.f32 %v1462_v21, %v596_v22 }
 0x141   : > { %v598_v24 = vmul.f32 0.5, %v597_v23 }
 0x143   : > { %v599_v25 = vsub.f32 1.5, %v598_v24 }
 0x145   : > { %v600_v26 = vmul.f32 %v1462_v21, %v599_v25  ;;  %v1450_v25 = vld [vmem:[#allocation10 + $0x1] ss:$0 sm:$0xff] }
 0x147   : > { %v604_v28 = vsel %vm603_vm4, %v1462_v21, %v600_v26 }
 0x148   : > { %v605_v29 = vmul.f32 %v604_v28, %v588_v11 }
 0x14a   : > { %v607_v31 = vmul.f32 %v1444_v27, %v605_v29  ;;  %v1451_v29 = vld [vmem:[#allocation12 + $0x1] ss:$0 sm:$0xff] }
 0x14c   : > { %v609_v32 = vadd.f32 %v1445_v30, %v607_v31 }
 0x14e   : > { %v610_v33 = vpack.c.bf16 %v609_v32, %v609_v32 }
 0x150   : > { %1272 = vmatmul.msk.bf16.vlgmr.msra.gmra.mxu0 %vm576_vm0, %v610_v33  ;;  %1281 = vmatmul.msk.bf16.vlgmr.msra.gmra.mxu1 %vm576_vm0, %v610_v33 }
 0x1cd   : > { %v643_v36 = vpop.f32.mrf.mxu0  ;;  %v677_v37 = vpop.f32.mrf.mxu1 }
 0x1ce   : > { %v644_v38 = vadd.f32 %v1446_v34, %v643_v36  ;;  %v678_v39 = vadd.f32 %v1447_v35, %v677_v37 }
 0x1d0   : > { %v681_v42 = vadd.f32 %v678_v39, %v609_v32  ;;  %v647_v43 = vadd.f32 %v644_v38, %v609_v32 }
 0x1d2   : > { %v686_v44 = vmul.f32 %v1448_v40, %v681_v42  ;;  %v692_v45 = vmul.f32 %v1449_v41, %v681_v42  ;;  %v805_v41 = vld [vmem:[#allocation12 + $0x2] sm:$0x1] }
 0x1d3   : > { %v807_v42 = vsel %vm806_vm14, %v805_v41, 0.0 }
 0x1d4   : > { %v687_v46 = vadd.f32 %v686_v44, %v647_v43  ;;  %v694_v49 = vmul.f32 %v692_v45, %v692_v45 }
 0x1d5   : > { %v645_v47 = vpop.f32.mrf.mxu0  ;;  %v679_v48 = vpop.f32.mrf.mxu1 }
 0x1d6   : > { %v693_v50 = vmul.f32 %v687_v46, %v687_v46 }
 0x1d8   : > { %v695_v51 = vadd.f32 %v694_v49, %v693_v50  ;;  %v811_v50 = vld [vmem:[#allocation12 + $0x3] sm:$0x1] }
 0x1da   : > { %v696_v52 = vadd.f32 1e-08, %v695_v51 }
 0x1dc   : > { %1463 = vrsqrt.f32 %v696_v52  ;;  %vm703_vm6 = vweird.f32 %v696_v52 }
 0x1e2   : > { %v1464_v53 = vpop.eup %1463 }
 0x1e3   : > { %v698_v54 = vmul.f32 %v1464_v53, %v696_v52  ;;  %vm704_vm5 = vweird.f32 %v1464_v53 }
 0x1e4   : > { %vm705_vm7 = vmor %vm703_vm6, %vm704_vm5  ;;  %vm910_vm5 = vcmask 1043456  }
 0x1e5   : > { %v699_v55 = vmul.f32 %v1464_v53, %v698_v54 }
 0x1e7   : > { %v700_v56 = vmul.f32 0.5, %v699_v55 }
 0x1e9   : > { %v701_v57 = vsub.f32 1.5, %v700_v56 }
 0x1eb   : > { %v702_v58 = vmul.f32 %v1464_v53, %v701_v57 }
 0x1ed   : > { %v706_v59 = vsel %vm705_vm7, %v1464_v53, %v702_v58  ;;  %v812_v53 = vsel %vm806_vm14, %v811_v50, 0.0 }
 0x1ee   : > { %v707_v60 = vmul.f32 %v706_v59, %v687_v46  ;;  %v736_v62 = vmul.f32 %v706_v59, %v692_v45 }
 0x1f0   : > { %v710_v61 = vsel %vm576_vm0, %v707_v60, 0.0  ;;  %v737_v63 = vsel %vm576_vm0, %v736_v62, 0.0 }
 0x1f1   : > { %711 = vadd.xlane.f32.xlu1 %v710_v61 }
 0x1f9   : > { %738 = vadd.xlane.f32.xlu1 %v737_v63 }
 0x264   : > { %v712_v0 = vpop.xlane.xlu1 %711 }
 0x265   : > { %v713_v1 = vmul.f32 %v712_v0, %v2020_v8 }
 0x267   : > { %v714_v2 = vsub.f32 %v707_v60, %v713_v1 }
 0x269   : > { %v715_v3 = vmul.f32 %v714_v2, %v714_v2 }
 0x26b   : > { %v716_v4 = vsel %vm576_vm0, %v715_v3, 0.0 }
 0x26c   : > { %717 = vadd.xlane.f32.xlu2 %v716_v4  ;;  %v739_v5 = vpop.xlane.xlu1 %738 }
 0x26d   : > { %v740_v6 = vmul.f32 %v739_v5, %v2020_v8 }
 0x26f   : > { %v741_v7 = vsub.f32 %v736_v62, %v740_v6 }
 0x271   : > { %v742_v9 = vmul.f32 %v741_v7, %v741_v7 }
 0x273   : > { %v743_v10 = vsel %vm576_vm0, %v742_v9, 0.0  ;;  %v1453_v9 = vld [vmem:[#allocation10 + $0x2] ss:$0 sm:$0xff] }
 0x274   : > { %744 = vadd.xlane.f32.xlu2 %v743_v10  ;;  %v1454_v10 = vld [vmem:[#allocation10 + $0x4] ss:$0 sm:$0xff] }
 0x2df   : > { %v718_v11 = vpop.xlane.xlu2 %717 }
 0x2e0   : > { %v719_v12 = vmul.f32 %v718_v11, %v2020_v8 }
 0x2e2   : > { %v720_v13 = vadd.f32 1e-05, %v719_v12 }
 0x2e4   : > { %1465 = vrsqrt.f32 %v720_v13  ;;  %vm727_vm9 = vweird.f32 %v720_v13 }
 0x2e7   : > { %v745_v14 = vpop.xlane.xlu2 %744 }
 0x2e8   : > { %v746_v15 = vmul.f32 %v745_v14, %v2020_v8  ;;  %v1455_v14 = vld [vmem:[#allocation12 + $0x4] ss:$0 sm:$0xff] }
 0x2ea   : > { %v1466_v16 = vpop.eup %1465  ;;  %v747_v17 = vadd.f32 1e-05, %v746_v15 }
 0x2eb   : > { %v722_v18 = vmul.f32 %v1466_v16, %v720_v13  ;;  %vm728_vm8 = vweird.f32 %v1466_v16 }
 0x2ec   : > { %1467 = vrsqrt.f32 %v747_v17  ;;  %vm729_vm10 = vmor %vm727_vm9, %vm728_vm8  ;;  %vm754_vm12 = vweird.f32 %v747_v17 }
 0x2ed   : > { %v723_v19 = vmul.f32 %v1466_v16, %v722_v18 }
 0x2ef   : > { %v724_v20 = vmul.f32 0.5, %v723_v19 }
 0x2f1   : > { %v725_v21 = vsub.f32 1.5, %v724_v20 }
 0x2f2   : > { %v1468_v22 = vpop.eup %1467 }
 0x2f3   : > { %v726_v23 = vmul.f32 %v1466_v16, %v725_v21  ;;  %v749_v24 = vmul.f32 %v1468_v22, %v747_v17  ;;  %vm755_vm11 = vweird.f32 %v1468_v22 }
 0x2f4   : > { %vm756_vm13 = vmor %vm754_vm12, %vm755_vm11 }
 0x2f5   : > { %v750_v26 = vmul.f32 %v1468_v22, %v749_v24  ;;  %v730_v27 = vsel %vm729_vm10, %v1466_v16, %v726_v23  ;;  %vm884_vm10 = vcmask 64512  }
 0x2f6   : > { %v731_v28 = vmul.f32 %v730_v27, %v714_v2 }
 0x2f7   : > { %v751_v30 = vmul.f32 0.5, %v750_v26 }
 0x2f8   : > { %v733_v31 = vmul.f32 %v1450_v25, %v731_v28 }
 0x2f9   : > { %v752_v32 = vsub.f32 1.5, %v751_v30 }
 0x2fa   : > { %v735_v33 = vadd.f32 %v1451_v29, %v733_v31 }
 0x2fb   : > { %v753_v34 = vmul.f32 %v1468_v22, %v752_v32 }
 0x2fc   : > { %v761_v35 = vsel %vm576_vm0, %v735_v33, 0.0 }
 0x2fd   : > { %762 = vadd.xlane.f32.xlu0 %v761_v35  ;;  %v757_v36 = vsel %vm756_vm13, %v1468_v22, %v753_v34 }
 0x2fe   : > { %v758_v37 = vmul.f32 %v757_v36, %v741_v7  ;;  %v1452_v7 = vld [vmem:[#allocation10 + $0x3] ss:$0 sm:$0xff]  ;;  %v839_v36 = vlaneseq }
 0x300   : > { %v759_v38 = vmul.f32 %v1450_v25, %v758_v37  ;;  %v840_v37 = vand.u32 127, %v839_v36 }
 0x302   : > { %v760_v39 = vadd.f32 %v1451_v29, %v759_v38 }
 0x304   : > { %v783_v40 = vsel %vm576_vm0, %v760_v39, 0.0 }
 0x305   : > { %784 = vadd.xlane.f32.xlu1 %v783_v40 }
 0x30d   : > { %808 = vadd.xlane.f32.xlu1 %v807_v42 }
 0x370   : > { %v763_v43 = vpop.xlane.xlu0 %762 }
 0x371   : > { %v764_v44 = vmul.f32 %v763_v43, %v2020_v8 }
 0x373   : > { %v765_v45 = vsub.f32 %v735_v33, %v764_v44 }
 0x375   : > { %v766_v46 = vmul.f32 %v765_v45, %v765_v45 }
 0x377   : > { %v767_v47 = vsel %vm576_vm0, %v766_v46, 0.0 }
 0x378   : > { %768 = vadd.xlane.f32.xlu2 %v767_v47  ;;  %v785_v48 = vpop.xlane.xlu1 %784 }
 0x379   : > { %v786_v49 = vmul.f32 %v785_v48, %v2020_v8 }
 0x37b   : > { %v787_v51 = vsub.f32 %v760_v39, %v786_v49 }
 0x37d   : > { %v788_v52 = vmul.f32 %v787_v51, %v787_v51 }
 0x37f   : > { %v789_v54 = vsel %vm576_vm0, %v788_v52, 0.0 }
 0x380   : > { %790 = vadd.xlane.f32.xlu0 %v789_v54  ;;  %813 = vadd.xlane.f32.xlu2 %v812_v53  ;;  %v809_v59 = vpop.xlane.xlu1 %808 }
 0x381   : > { %1314 = vpush %v809_v59 }
 0x3b2   : > { %s1315_s1 = spop %1314 }
 0x3eb   : > { %v769_v55 = vpop.xlane.xlu2 %768 }
 0x3ec   : > { %v770_v56 = vmul.f32 %v769_v55, %v2020_v8 }
 0x3ee   : > { %v771_v57 = vadd.f32 1e-05, %v770_v56 }
 0x3f0   : > { %1469 = vrsqrt.f32 %v771_v57  ;;  %vm778_vm1 = vweird.f32 %v771_v57 }
 0x3f3   : > { %v791_v58 = vpop.xlane.xlu0 %790  ;;  %v814_v61 = vpop.xlane.xlu2 %813 }
 0x3f4   : > { %v792_v60 = vmul.f32 %v791_v58, %v2020_v8  ;;  %1316 = vpush %v814_v61 }
 0x3f6   : > { %v1470_v62 = vpop.eup %1469  ;;  %v793_v63 = vadd.f32 1e-05, %v792_v60 }
 0x3f7   : > { %v773_v0 = vmul.f32 %v1470_v62, %v771_v57  ;;  %vm779_vm15 = vweird.f32 %v1470_v62 }
 0x3f8   : > { %1471 = vrsqrt.f32 %v793_v63  ;;  %vm780_vm2 = vmor %vm778_vm1, %vm779_vm15  ;;  %vm800_vm4 = vweird.f32 %v793_v63 }
 0x3f9   : > { %v774_v1 = vmul.f32 %v1470_v62, %v773_v0 }
 0x3fb   : > { %v775_v2 = vmul.f32 0.5, %v774_v1 }
 0x3fd   : > { %v776_v3 = vsub.f32 1.5, %v775_v2 }
 0x3fe   : > { %v1472_v4 = vpop.eup %1471 }
 0x3ff   : > { %v777_v5 = vmul.f32 %v1470_v62, %v776_v3  ;;  %v795_v6 = vmul.f32 %v1472_v4, %v793_v63  ;;  %vm801_vm3 = vweird.f32 %v1472_v4 }
 0x400   : > { %vm802_vm6 = vmor %vm800_vm4, %vm801_vm3 }
 0x401   : > { %v796_v11 = vmul.f32 %v1472_v4, %v795_v6  ;;  %v781_v12 = vsel %vm780_vm2, %v1470_v62, %v777_v5  ;;  %vm996_vm2 = vcmask 257024  }
 0x402   : > { %v782_v13 = vmul.f32 %v781_v12, %v765_v45 }
 0x403   : > { %v797_v15 = vmul.f32 0.5, %v796_v11 }
 0x404   : > { %v830_v16 = vmul.f32 %v1452_v7, %v782_v13  ;;  %v820_v17 = vmul.f32 %v1453_v9, %v782_v13  ;;  %v899_v18 = vmul.f32 %v1454_v10, %v782_v13 }
 0x405   : > { %v798_v19 = vsub.f32 1.5, %v797_v15 }
 0x406   : > { %v831_v20 = vsel %vm576_vm0, %v830_v16, 0.0  ;;  %v821_v21 = vsel %vm576_vm0, %v820_v17, 0.0  ;;  %v902_v22 = vadd.f32 %v1455_v14, %v899_v18 }
 0x407   : > { %v799_v23 = vmul.f32 %v1472_v4, %v798_v19  ;;  %832 = vadd.xlane.f32.xlu0 %v831_v20  ;;  %822 = vadd.xlane.f32.xlu2 %v821_v21 }
 0x408   : > { %v903_v24 = vpack.c.bf16 %v902_v22, %v902_v22 }
 0x409   : > { %v803_v25 = vsel %vm802_vm6, %v1472_v4, %v799_v23 }
 0x40a   : > { %v912_v26 = vsel %vm910_vm5, %v903_v24, 0  ;;  %v804_v27 = vmul.f32 %v803_v25, %v787_v51  ;;  %v1313_v24 = vld [vmem:[#allocation15 + $0x8] sm:$0xff]  ;;  %v1311_v25 = vld [vmem:[#allocation13 + $0x8] sm:$0xff] }
 0x40b   : > { %921 = vmatpush.bf16.msra.mxu2 %v912_v26 }
 0x40c   : > { %v834_v28 = vmul.f32 %v1452_v7, %v804_v27  ;;  %v824_v29 = vmul.f32 %v1453_v9, %v804_v27  ;;  %v904_v30 = vmul.f32 %v1454_v10, %v804_v27 }
 0x40e   : > { %v835_v31 = vsel %vm576_vm0, %v834_v28, 0.0  ;;  %v825_v32 = vsel %vm576_vm0, %v824_v29, 0.0  ;;  %v905_v33 = vadd.f32 %v1455_v14, %v904_v30  ;;  %v1312_v30 = vld [vmem:[#allocation15] sm:$0xff] }
 0x40f   : > { %836 = vadd.xlane.f32.xlu1 %v835_v31  ;;  %826 = vadd.xlane.f32.xlu0 %v825_v32  ;;  %v1310_v31 = vld [vmem:[#allocation13] sm:$0xff] }
 0x410   : > { %v906_v34 = vpack.c.bf16 %v905_v33, %v905_v33  ;;  %1032 = vmatpush.bf16.msrb.mxu2 %v1313_v24 }
 0x412   : > { %v928_v35 = vsel %vm910_vm5, %v906_v34, 0 }
 0x413   : > { %937 = vmatpush.bf16.msra.mxu3 %v928_v35 }
 0x414   : > { %1033 = vmatpush.bf16.msrb.mxu2 %v1312_v30 }
 0x417   : > { %1060 = vmatpush.bf16.msrb.mxu3 %v1311_v25 }
 0x41b   : > { %1061 = vmatpush.bf16.msrb.mxu3 %v1310_v31 }
 0x425   : > { %s1317_s12 = spop %1316 }
 0x426   : > { %s816_s24 = ssub.f32 %s1315_s1, %s1317_s12  ;;  %s564_s12 = scalar_lea.vmem [#allocation16], %s1256_s20 }
 0x427   : > { %s2153_s1 = sld [smem:[#allocation27_spill]] }
 0x428   : > { %s817_s28 = sadd.f32 1e-08, %s816_s24  ;;  %s1087_s24 = sshll.u32 %s564_s12, 4  ;;  %s1088_s24 = int_to_ptr.vmem [resolvable:$true] %s1087_s24 }
 0x42a   : > { %v856_v42 = vstv %s817_s28  ;;  %s1089_s28 = sshll.u32 %s1085_s19, 4  ;;  %s1090_s28 = int_to_ptr.hbm [resolvable:$true] %s1089_s28 }
 0x42b   : > { %s1707_s0 = sshra.s32 %s1090_s28, 4  ;;  %s1708_s0 = int_to_ptr.hbm [resolvable:$true] %s1707_s0 }
 0x42c   : > { %s1709_s29 = scalar_lea.hbm %s1708_s0, 8  ;;  %p1714_p9 = scmp.lt.s32.totalorder %s1708_s0, %s2152_s18 }
 0x42d   : > { %p1710_p1 = scmp.ne.s32.totalorder %s1708_s0, %s1709_s29  ;;  %p1715_p10 = scmp.lt.s32.totalorder %s1713_s13, %s1709_s29 }
 0x42f   : > { %p1711_p3 = pnand %p1710_p1, %p1977_p0  ;;  %p1716_p12 = por %p1715_p10, %p1714_p9 }
 0x431   : > { %p1712_p8 = pneg %p1711_p3 }
 0x433   : > { %p1717_p13 = pnand %p1716_p12, %p1712_p8 }
 0x47a   : > { %v833_v38 = vpop.xlane.xlu0 %832  ;;  %v823_v40 = vpop.xlane.xlu2 %822 }
 0x47b   : > { %v841_v39 = vperm.slane %v833_v38, %v840_v37 }
 0x47d   : > { %v855_v41 = vsub.f32 %v823_v40, %v841_v39 }
 0x47f   : > { %v857_v46 = vadd.f32 %v856_v42, %v855_v41 }
 0x481   : > { %v869_v49 = vmul.f32 %v857_v46, %v857_v46 }
 0x482   : > { %v837_v43 = vpop.xlane.xlu1 %836  ;;  %v827_v45 = vpop.xlane.xlu0 %826 }
 0x483   : > { %v859_v44 = vperm.slane %v837_v43, %v840_v37 }
 0x485   : > { %v867_v47 = vsub.f32 %v827_v45, %v859_v44  ;;  %v1456_v44 = vld [vmem:[#allocation10 + $0x5] ss:$0 sm:$0xff] }
 0x487   : > { %v868_v48 = vadd.f32 %v867_v47, %v856_v42  ;;  %v1457_v47 = vld [vmem:[#allocation12 + $0x5] ss:$0 sm:$0xff] }
 0x489   : > { %v870_v50 = vmul.f32 %v868_v48, %v868_v48 }
 0x48b   : > { %v871_v51 = vadd.f32 %v870_v50, %v869_v49 }
 0x48d   : > { %1473 = vrsqrt.f32 %v871_v51  ;;  %vm878_vm8 = vweird.f32 %v871_v51 }
 0x493   : > { %v1474_v52 = vpop.eup %1473 }
 0x494   : > { %v873_v53 = vmul.f32 %v1474_v52, %v871_v51  ;;  %vm879_vm7 = vweird.f32 %v1474_v52 }
 0x495   : > { %vm880_vm9 = vmor %vm878_vm8, %vm879_vm7 }
 0x496   : > { %v874_v54 = vmul.f32 %v1474_v52, %v873_v53 }
 0x498   : > { %v875_v55 = vmul.f32 0.5, %v874_v54 }
 0x49a   : > { %v876_v56 = vsub.f32 1.5, %v875_v55 }
 0x49c   : > { %v877_v57 = vmul.f32 %v1474_v52, %v876_v56 }
 0x49e   : > { %v881_v58 = vsel %vm880_vm9, %v1474_v52, %v877_v57 }
 0x49f   : > { %v882_v59 = vmul.f32 %v881_v58, %v857_v46 }
 0x4a1   : > { %v883_v60 = vmul.f32 10.0, %v882_v59 }
 0x4a3   : > { %v885_v61 = vsel %vm884_vm10, %v883_v60, -inf }
 0x4a4   : > { %886 = vmax.xlane.f32.xlu1 %v885_v61 }
 0x517   : > { %v887_v62 = vpop.xlane.xlu1 %886 }
 0x518   : > { %v888_v63 = vsub.f32 %v883_v60, %v887_v62  ;;  %v1458_v60 = vld [vmem:[%s2153_s1] ss:$0 sm:$0xff] }
 0x51a   : > { %v889_v0 = vmul.f32 1.442695, %v888_v63 }
 0x51c   : > { %1475 = vpow2.f32 %v889_v0 }
 0x522   : > { %v1476_v1 = vpop.eup %1475 }
 0x523   : > { %v891_v2 = vsel %vm884_vm10, %v1476_v1, 0.0 }
 0x524   : > { %892 = vadd.xlane.f32.xlu2 %v891_v2 }
 0x597   : > { %v893_v3 = vpop.xlane.xlu2 %892 }
 0x598   : > { %1477 = vrcp.f32 %v893_v3 }
 0x59e   : > { %v1478_v4 = vpop.eup %1477 }
 0x59f   : > { %v895_v5 = vmul.f32 %v1478_v4, %v1476_v1 }
 0x5a1   : > { %v896_v6 = vpack.c.bf16 %v895_v5, %v895_v5 }
 0x5a3   : > { %1282 = vmatmul.msk.bf16.vlgmr.msra.gmra.mxu2 %vm884_vm10, %v896_v6  ;;  %1283 = vmatmul.msk.bf16.vlgmr.msra.gmra.mxu3 %vm884_vm10, %v896_v6 }
 0x626   : > { %v923_v7 = vpop.f32.mrf.mxu2  ;;  %v939_v9 = vpop.f32.mrf.mxu3 }
 0x627   : > { %v971_v10 = vsel %vm576_vm0, %v939_v9, 0.0  ;;  %v945_v11 = vsel %vm576_vm0, %v923_v7, 0.0 }
 0x628   : > { %972 = vadd.xlane.f32.xlu1 %v971_v10  ;;  %946 = vadd.xlane.f32.xlu0 %v945_v11 }
 0x62e   : > { %v925_v12 = vpop.f32.mrf.mxu2  ;;  %v941_v13 = vpop.f32.mrf.mxu3 }
 0x69b   : > { %v973_v14 = vpop.xlane.xlu1 %972  ;;  %v947_v15 = vpop.xlane.xlu0 %946 }
 0x69c   : > { %v974_v16 = vmul.f32 %v973_v14, %v2020_v8  ;;  %v948_v17 = vmul.f32 %v947_v15, %v2020_v8 }
 0x69e   : > { %v975_v18 = vsub.f32 %v939_v9, %v974_v16  ;;  %v949_v19 = vsub.f32 %v923_v7, %v948_v17 }
 0x6a0   : > { %v976_v20 = vmul.f32 %v975_v18, %v975_v18  ;;  %v950_v21 = vmul.f32 %v949_v19, %v949_v19 }
 0x6a2   : > { %v977_v22 = vsel %vm576_vm0, %v976_v20, 0.0  ;;  %v951_v23 = vsel %vm576_vm0, %v950_v21, 0.0 }
 0x6a3   : > { %978 = vadd.xlane.f32.xlu0 %v977_v22  ;;  %952 = vadd.xlane.f32.xlu2 %v951_v23 }
 0x716   : > { %v953_v26 = vpop.xlane.xlu2 %952  ;;  %v979_v27 = vpop.xlane.xlu0 %978 }
 0x717   : > { %v954_v28 = vmul.f32 %v953_v26, %v2020_v8  ;;  %v980_v29 = vmul.f32 %v979_v27, %v2020_v8 }
 0x719   : > { %v955_v32 = vadd.f32 1e-05, %v954_v28  ;;  %v981_v33 = vadd.f32 1e-05, %v980_v29 }
 0x71b   : > { %1479 = vrsqrt.f32 %v955_v32  ;;  %vm962_vm13 = vweird.f32 %v955_v32  ;;  %vm988_vm15 = vweird.f32 %v981_v33 }
 0x71c   : > { %1481 = vrsqrt.f32 %v981_v33 }
 0x721   : > { %v1480_v34 = vpop.eup %1479 }
 0x722   : > { %v1482_v35 = vpop.eup %1481  ;;  %v957_v36 = vmul.f32 %v1480_v34, %v955_v32  ;;  %vm963_vm11 = vweird.f32 %v1480_v34 }
 0x723   : > { %v983_v37 = vmul.f32 %v1482_v35, %v981_v33  ;;  %vm989_vm12 = vweird.f32 %v1482_v35  ;;  %vm964_vm14 = vmor %vm962_vm13, %vm963_vm11 }
 0x724   : > { %v958_v38 = vmul.f32 %v1480_v34, %v957_v36  ;;  %vm990_vm1 = vmor %vm988_vm15, %vm989_vm12 }
 0x725   : > { %v984_v39 = vmul.f32 %v1482_v35, %v983_v37 }
 0x726   : > { %v959_v40 = vmul.f32 0.5, %v958_v38 }
 0x727   : > { %v985_v41 = vmul.f32 0.5, %v984_v39 }
 0x728   : > { %v960_v42 = vsub.f32 1.5, %v959_v40 }
 0x729   : > { %v986_v8 = vsub.f32 1.5, %v985_v41 }
 0x72a   : > { %v961_v43 = vmul.f32 %v1480_v34, %v960_v42 }
 0x72b   : > { %v987_v45 = vmul.f32 %v1482_v35, %v986_v8 }
 0x72c   : > { %v965_v46 = vsel %vm964_vm14, %v1480_v34, %v961_v43 }
 0x72d   : > { %v966_v48 = vmul.f32 %v965_v46, %v949_v19  ;;  %v991_v49 = vsel %vm990_vm1, %v1482_v35, %v987_v45 }
 0x72e   : > { %v992_v50 = vmul.f32 %v991_v49, %v975_v18 }
 0x72f   : > { %v968_v51 = vmul.f32 %v1456_v44, %v966_v48 }
 0x730   : > { %v993_v52 = vmul.f32 %v1456_v44, %v992_v50 }
 0x731   : > { %v970_v53 = vadd.f32 %v1457_v47, %v968_v51 }
 0x732   : > { %v994_v54 = vadd.f32 %v1457_v47, %v993_v52 }
 0x733   : > { %v995_v55 = vpack.c.bf16 %v970_v53, %v970_v53 }
 0x734   : > { %v998_v56 = vpack.c.bf16 %v994_v54, %v994_v54 }
 0x735   : > { %997 = vst.msk [vmem:[#allocation2] sm:$0xf] %vm996_vm2, %v995_v55 }
 0x736   : > { %999 = vst.msk [vmem:[#allocation3] sm:$0xf] %vm996_vm2, %v998_v56 }
 0x73c   : > { %v1000_v57 = vld [vmem:[#allocation2] sm:$0xf] }
 0x73d   : > { %v1005_v58 = vld [vmem:[#allocation3] sm:$0xf]  ;;  %1301 = vmatmul.msk.bf16.vlgmr.msrb.gmra.mxu3 %vm576_vm0, %v1000_v57 }
 0x73e   : > { %1292 = vmatmul.msk.bf16.vlgmr.msrb.gmra.mxu2 %vm576_vm0, %v1005_v58 }
 0x7c0   : > { %v1063_v59 = vpop.f32.mrf.mxu3 }
 0x7c1   : > { %v1035_v61 = vpop.f32.mrf.mxu2 }
 0x7c2   : > { %v1064_v62 = vadd.f32 %v1063_v59, %v1035_v61 }
 0x7c4   : > { %v1071_v63 = vadd.f32 %v1458_v60, %v1064_v62 }
 0x7c6   : > { %1072 = vst [vmem:[%s564_s12] sm:$0xff] %v1071_v63 }
 0x7c7   : > { %1720 = shalt.err (!%p1717_p13)
}
 0x7c8   : > { %1344 = dma.vmem_to_hbm [thread:$0]  (%p1977_p0), %s1088_s24, 128, %s1090_s28, %s1074_s14   ;;  %v1065_v0 = vpop.f32.mrf.mxu3 }
 0x7c9   : > { %v1037_v1 = vpop.f32.mrf.mxu2 }
 0x7ca PF: > { %s1101_s11 = sand.u32 1, %s1767_s21   ;;  %p1370_p2 = pnand %p1252_p6, %p1984_p5 }
 0x7cb   : > { %s1102_s19 = scalar_lea.sflag [#allocation6], %s1101_s11 }
 0x7cc   : > { %p1371_p4 = pneg %p1370_p2 }
 0x7ce   : > { %1762 = dma.done.wait (%p1371_p4), %s1102_s19, 128  }
 0x7cf   : > { %1764 = vsyncadd (%p1371_p4), %s1102_s19, 4294967168  ;;  %s31_s26 = sadd.s32 1, %s1787_s26   ;;  %s2154_s21 = smov %s1771_s22 }
 0x7d0   : > { %p28_p7 = scmp.ge.s32.totalorder %s31_s26, 4   ;;  %s2155_s22 = smov %s1775_s23 }
 0x7d1   : > { %s2156_s23 = smov %s1982_s27  ;;  %s2157_s24 = smov %s1783_s25 }
 0x7d2   : > { %s2158_s25 = smov %s2160_s7  ;;  %30 = sbr.rel (!%p28_p7) target bundleno = 16 (0x10), region = 146 }
 0x7d7   :  { %1108 = vsyncpa [#allocation5], 1 }
 0x7d8   :  { %1110 = vsyncpa [#allocation5 + $0x1], 1 }
 0x7d9   :  { %1111 = vsyncpa [#allocation8], 1 }
 0x7da   :  { %1112 = vsyncpa [#allocation11], 1 }
 0x7db   :  { %1113 = vsyncpa [#allocation14], 1 }
 0x7dc   :  { %1114 = vsyncpa [#allocation6], 1 }
 0x7dd   :  { %1116 = vsyncpa [#allocation6 + $0x1], 1 }

</bundles_post_ra>
